<compile_context>
chip_gen: v7x
topology: tpu7x:2x2x1
jax: 0.10.0
libtpu: 0.0.40
codegen_flags: <defaults>
</compile_context>

<pallas_src>
import functools

import jax
import jax.numpy as jnp
from jax import lax
from jax.experimental import pallas as pl
from jax.experimental.pallas import tpu as pltpu


# ---------------------------------------------------------------------------
# Fused RDB kernel (one image per grid step)
# ---------------------------------------------------------------------------
def _rdb_fused_kernel(x_ref, wc_ref, bc_ref, wl_ref, bl_ref, o_ref,
                      feat_ref, col_ref, pad_ref, *, G0, C, G, H, W):
    """Whole RDB for one image; channels = sublanes, flat H*W = lanes.

    x_ref   : (G0, H*W)                 input image (f32)
    wc_ref  : (C, G, 9*Cvis)            3x3 weights, im2col layout (f32)
    bc_ref  : (C, G, 1)                 3x3 biases
    wl_ref  : (G0, Ctot)                1x1 LFF weights
    bl_ref  : (G0, 1)                   LFF bias
    o_ref   : (G0, H*W)                 output image
    feat_ref: (Ctot, H*W)               growing feature map ("torch.cat" free)
    col_ref : (9*Cvis, H*W)             im2col staging (incremental refresh)
    pad_ref : (max(G0,G), H*W+2*(W+1))  lane-halo'd shift staging
    """
    HW = H * W
    Cvis = G0 + (C - 1) * G            # channels any 3x3 stage ever consumes
    base = W + 1                       # lane offset of the image in pad_ref

    # Per-step init (a few dozen vector stores; unconditional so the kernel is
    # correct even if the batch axis is sharded across TensorCores).
    col_ref[...] = jnp.zeros_like(col_ref)
    pad_ref[...] = jnp.zeros_like(pad_ref)

    # Input channels become feature rows [0:G0) — lane-dense store.
    feat_ref[0:G0, :] = x_ref[...]

    # Horizontal-tap validity masks (vertical taps are handled by the zero
    # lane-halo of pad_ref); computed once, reused by every stage.
    q = lax.broadcasted_iota(jnp.int32, (1, HW), 1) % W
    left_edge = q == 0                 # source column q-1 is out of range
    right_edge = q == W - 1            # source column q+1 is out of range

    def refresh(c_lo, c_hi):
        """Rebuild im2col rows for feature channels [c_lo, c_hi) only."""
        cnt = c_hi - c_lo
        pad_ref[0:cnt, base:base + HW] = feat_ref[c_lo:c_hi, :]
        for kh in range(3):
            for kw in range(3):
                d = (kh - 1) * W + (kw - 1)        # flattened spatial shift
                sh = pad_ref[0:cnt, base + d:base + d + HW]
                if kw == 0:
                    sh = jnp.where(left_edge, 0.0, sh)
                elif kw == 2:
                    sh = jnp.where(right_edge, 0.0, sh)
                t = kh * 3 + kw
                col_ref[t * Cvis + c_lo:t * Cvis + c_hi, :] = sh

    # C x (conv3x3 + bias + ReLU): each stage = ONE MXU matmul with a
    # lane-dense (G, HW) result written straight into its feature rows.
    # Channels a stage must not see have zero (host-padded) weight entries and
    # finite (zeroed) im2col rows, so they contribute exactly 0.
    for i in range(C):
        c_lo = 0 if i == 0 else G0 + (i - 1) * G
        c_hi = G0 + i * G
        refresh(c_lo, c_hi)
        acc = jnp.dot(wc_ref[i], col_ref[...],
                      preferred_element_type=jnp.float32)       # (G, HW)
        feat_ref[c_hi:c_hi + G, :] = jnp.maximum(acc + bc_ref[i], 0.0)

    # LFF 1x1 conv + bias + residual add, fused; lane-dense output store.
    y = jnp.dot(wl_ref[...], feat_ref[...],
                preferred_element_type=jnp.float32)             # (G0, HW)
    o_ref[...] = (y + bl_ref[...] + x_ref[...]).astype(o_ref.dtype)


# ---------------------------------------------------------------------------
# Host-side weight packing + wrapper
# ---------------------------------------------------------------------------
def _pack_params(params):
    convs = params["convs"]
    C = len(convs)
    G = convs[0][0].shape[-1]
    G0 = convs[0][0].shape[2]
    Cvis = G0 + (C - 1) * G
    w_list, b_list = [], []
    for (w, b) in convs:                     # w: (3, 3, Cin, G) HWIO
        cin = w.shape[2]
        wp = jnp.pad(w, ((0, 0), (0, 0), (0, Cvis - cin), (0, 0)))
        # K index = (kh*3 + kw) * Cvis + c  ->  (G, 9*Cvis)
        w_list.append(jnp.transpose(wp, (3, 0, 1, 2)).reshape(G, 9 * Cvis))
        b_list.append(b.reshape(G, 1))
    w_all = jnp.stack(w_list).astype(jnp.float32)          # (C, G, 9*Cvis)
    b_all = jnp.stack(b_list).astype(jnp.float32)          # (C, G, 1)
    wl = jnp.transpose(params["lff_w"]).astype(jnp.float32)    # (G0, Ctot)
    bl = params["lff_b"].reshape(-1, 1).astype(jnp.float32)    # (G0, 1)
    return w_all, b_all, wl, bl


@jax.jit
def rdb_forward(x_nchw, params):
    """NCHW in / NCHW out, matching the PyTorch RDB module (no transposes)."""
    N, G0, H, W = x_nchw.shape
    C = len(params["convs"])
    G = params["convs"][0][0].shape[-1]
    Ctot = G0 + C * G
    Cvis = G0 + (C - 1) * G
    HW = H * W

    w_all, b_all, wl, bl = _pack_params(params)
    x = x_nchw.reshape(N, G0, HW)            # free reshape, no transpose

    kernel = functools.partial(_rdb_fused_kernel, G0=G0, C=C, G=G, H=H, W=W)

    y = pl.pallas_call(
        kernel,
        out_shape=jax.ShapeDtypeStruct((N, G0, HW), x_nchw.dtype),
        grid_spec=pltpu.PrefetchScalarGridSpec(
            num_scalar_prefetch=0,
            grid=(N,),                       # one image per grid step
            in_specs=[
                pl.BlockSpec((pl.Squeezed(), G0, HW), lambda n: (n, 0, 0)),
                # constant index_maps -> weights/biases stay VMEM-resident
                pl.BlockSpec((C, G, 9 * Cvis), lambda n: (0, 0, 0)),
                pl.BlockSpec((C, G, 1), lambda n: (0, 0, 0)),
                pl.BlockSpec((G0, Ctot), lambda n: (0, 0)),
                pl.BlockSpec((G0, 1), lambda n: (0, 0)),
            ],
            out_specs=pl.BlockSpec((pl.Squeezed(), G0, HW),
                                   lambda n: (n, 0, 0)),
            scratch_shapes=[
                pltpu.VMEM((Ctot, HW), jnp.float32),             # feature map
                pltpu.VMEM((9 * Cvis, HW), jnp.float32),         # im2col
                pltpu.VMEM((max(G0, G), HW + 2 * (W + 1)),
                           jnp.float32),                         # lane halo
            ],
        ),
        compiler_params=pltpu.CompilerParams(
            dimension_semantics=("parallel",)),
    )(x, w_all, b_all, wl, bl)
    return y.reshape(N, G0, H, W)


# ---------------------------------------------------------------------------
# Parameter init (HWIO conv weights) and pure-JAX f32 reference
# ---------------------------------------------------------------------------
def init_rdb_params(key, G0, C, G):
    params = {"convs": [], "lff_w": None, "lff_b": None}
    for i in range(C):
        cin = G0 + i * G
        key, kw, kb = jax.random.split(key, 3)
        w = jax.random.normal(kw, (3, 3, cin, G), jnp.float32) * 0.05
        b = jax.random.normal(kb, (G,), jnp.float32) * 0.01
        params["convs"].append((w, b))
    cin = G0 + C * G
    key, kw, kb = jax.random.split(key, 3)
    params["lff_w"] = jax.random.normal(kw, (cin, G0), jnp.float32) * 0.05
    params["lff_b"] = jax.random.normal(kb, (G0,), jnp.float32) * 0.01
    return params


def rdb_reference(x_nchw, params):
    x = jnp.transpose(x_nchw, (0, 2, 3, 1))
    feat = x
    for (w, b) in params["convs"]:
        dn = lax.conv_dimension_numbers(feat.shape, w.shape,
                                        ("NHWC", "HWIO", "NHWC"))
        out = lax.conv_general_dilated(feat, w, (1, 1), "SAME",
                                       dimension_numbers=dn)
        feat = jnp.concatenate([feat, jnp.maximum(out + b, 0.0)], axis=-1)
    w1 = params["lff_w"][None, None]          # (1, 1, Ctot, G0)
    dn = lax.conv_dimension_numbers(feat.shape, w1.shape,
                                    ("NHWC", "HWIO", "NHWC"))
    lff = lax.conv_general_dilated(feat, w1, (1, 1), "VALID",
                                   dimension_numbers=dn) + params["lff_b"]
    return jnp.transpose(lff + x, (0, 3, 1, 2))


if __name__ == "__main__":
    # RDB(G0=8, C=3, G=8); input (N=2, G0=8, H=16, W=16) NCHW like PyTorch.
    G0, C, G = 8, 3, 8
    N, H, W = 2, 16, 16

    key = jax.random.PRNGKey(0)
    key, kx = jax.random.split(key)
    x = jax.random.normal(kx, (N, G0, H, W), jnp.float32)
    params = init_rdb_params(key, G0, C, G)

    out = jax.block_until_ready(rdb_forward(x, params))
    ref = rdb_reference(x, params)

    assert out.shape == (N, G0, H, W), out.shape
    # Full f32 data path in the kernel -> tight tolerance vs. the f32 reference
    # (both sides use the MXU's f32 matmul decomposition).
    assert jnp.allclose(out, ref, atol=1e-3, rtol=1e-3), (
        float(jnp.max(jnp.abs(out - ref))))

    print("KERNEL_OK")
</pallas_src>

<mosaic_0001>
module attributes {stable_mosaic.version = 11 : i64} {
  func.func @_rdb_fused_kernel(%arg0: i32, %arg1: memref<1x8x256xf32, #tpu.memory_space<vmem>>, %arg2: memref<3x8x216xf32, #tpu.memory_space<vmem>>, %arg3: memref<3x8x1xf32, #tpu.memory_space<vmem>>, %arg4: memref<8x32xf32, #tpu.memory_space<vmem>>, %arg5: memref<8x1xf32, #tpu.memory_space<vmem>>, %arg6: memref<1x8x256xf32, #tpu.memory_space<vmem>>, %arg7: memref<32x256xf32, #tpu.memory_space<vmem>>, %arg8: memref<216x256xf32, #tpu.memory_space<vmem>>, %arg9: memref<8x290xf32, #tpu.memory_space<vmem>>) attributes {dimension_semantics = [#tpu.dimension_semantics<parallel>], iteration_bounds = array<i64: 2>, scalar_prefetch = 0 : i64, scratch_operands = 3 : i64, tpu.core_type = #tpu.core_type<tc>, window_params = [{transform_indices = @transform_0, window_bounds = array<i64: 1, 8, 256>}, {pipeline_mode = #tpu.pipeline_mode<synchronous>, transform_indices = @transform_1, window_bounds = array<i64: 3, 8, 216>}, {pipeline_mode = #tpu.pipeline_mode<synchronous>, transform_indices = @transform_2, window_bounds = array<i64: 3, 8, 1>}, {pipeline_mode = #tpu.pipeline_mode<synchronous>, transform_indices = @transform_3, window_bounds = array<i64: 8, 32>}, {pipeline_mode = #tpu.pipeline_mode<synchronous>, transform_indices = @transform_4, window_bounds = array<i64: 8, 1>}, {transform_indices = @transform_5, window_bounds = array<i64: 1, 8, 256>}]} {
    %cst = arith.constant 0.000000e+00 : f32
    %0 = vector.broadcast %cst : f32 to vector<216x256xf32>
    %c0 = arith.constant 0 : index
    %c0_0 = arith.constant 0 : index
    %1 = vector.load %arg8[%c0, %c0_0] : memref<216x256xf32, #tpu.memory_space<vmem>>, vector<216x256xf32>
    tpu.vector_store %arg8[%c0, %c0_0], %0 {strides = array<i32>} : memref<216x256xf32, #tpu.memory_space<vmem>>, vector<216x256xf32>,
    %cst_1 = arith.constant 0.000000e+00 : f32
    %2 = vector.broadcast %cst_1 : f32 to vector<8x290xf32>
    %c0_2 = arith.constant 0 : index
    %c0_3 = arith.constant 0 : index
    %3 = vector.load %arg9[%c0_2, %c0_3] : memref<8x290xf32, #tpu.memory_space<vmem>>, vector<8x290xf32>
    tpu.vector_store %arg9[%c0_2, %c0_3], %2 {strides = array<i32>} : memref<8x290xf32, #tpu.memory_space<vmem>>, vector<8x290xf32>,
    %c0_4 = arith.constant 0 : index
    %c0_5 = arith.constant 0 : index
    %c0_6 = arith.constant 0 : index
    %4 = vector.load %arg1[%c0_4, %c0_5, %c0_6] : memref<1x8x256xf32, #tpu.memory_space<vmem>>, vector<1x8x256xf32>
    %5 = vector.shape_cast %4 : vector<1x8x256xf32> to vector<8x256xf32>
    %c0_7 = arith.constant 0 : index
    %c0_8 = arith.constant 0 : index
    %6 = vector.load %arg7[%c0_7, %c0_8] : memref<32x256xf32, #tpu.memory_space<vmem>>, vector<8x256xf32>
    tpu.vector_store %arg7[%c0_7, %c0_8], %5 {strides = array<i32>} : memref<32x256xf32, #tpu.memory_space<vmem>>, vector<8x256xf32>,
    %7 = tpu.iota {dimensions = array<i32: 1>} : vector<1x256xi32>
    %c16_i32 = arith.constant 16 : i32
    %c0_i32 = arith.constant 0 : i32
    %8 = arith.cmpi eq, %c16_i32, %c0_i32 : i32
    %c1_i32 = arith.constant 1 : i32
    %9 = arith.select %8, %c1_i32, %c16_i32 : i32
    %10 = vector.broadcast %9 : i32 to vector<1x256xi32>
    %11 = arith.remsi %7, %10 : vector<1x256xi32>
    %c0_i32_9 = arith.constant 0 : i32
    %12 = vector.broadcast %c0_i32_9 : i32 to vector<1x256xi32>
    %13 = arith.cmpi ne, %11, %12 : vector<1x256xi32>
    %c0_i32_10 = arith.constant 0 : i32
    %14 = vector.broadcast %c0_i32_10 : i32 to vector<1x256xi32>
    %15 = arith.cmpi slt, %11, %14 : vector<1x256xi32>
    %c0_i32_11 = arith.constant 0 : i32
    %16 = arith.cmpi slt, %9, %c0_i32_11 : i32
    %17 = vector.broadcast %16 : i1 to vector<1x256xi1>
    %18 = vector.broadcast %17 : vector<1x256xi1> to vector<1x256xi1>
    %19 = arith.xori %15, %18 : vector<1x256xi1>
    %20 = arith.andi %19, %13 : vector<1x256xi1>
    %21 = vector.broadcast %9 : i32 to vector<1x256xi32>
    %22 = arith.addi %11, %21 : vector<1x256xi32>
    %23 = arith.select %20, %22, %11 : vector<1x256xi1>, vector<1x256xi32>
    %c0_i32_12 = arith.constant 0 : i32
    %24 = vector.broadcast %c0_i32_12 : i32 to vector<1x256xi32>
    %25 = arith.cmpi eq, %23, %24 : vector<1x256xi32>
    %c15_i32 = arith.constant 15 : i32
    %26 = vector.broadcast %c15_i32 : i32 to vector<1x256xi32>
    %27 = arith.cmpi eq, %23, %26 : vector<1x256xi32>
    %c0_13 = arith.constant 0 : index
    %c0_14 = arith.constant 0 : index
    %28 = vector.load %arg7[%c0_13, %c0_14] : memref<32x256xf32, #tpu.memory_space<vmem>>, vector<8x256xf32>
    %c0_15 = arith.constant 0 : index
    %c17 = arith.constant 17 : index
    %29 = vector.load %arg9[%c0_15, %c17] : memref<8x290xf32, #tpu.memory_space<vmem>>, vector<8x256xf32>
    tpu.vector_store %arg9[%c0_15, %c17], %28 {strides = array<i32>} : memref<8x290xf32, #tpu.memory_space<vmem>>, vector<8x256xf32>,
    %c0_16 = arith.constant 0 : index
    %c0_17 = arith.constant 0 : index
    %30 = vector.load %arg9[%c0_16, %c0_17] : memref<8x290xf32, #tpu.memory_space<vmem>>, vector<8x256xf32>
    %cst_18 = arith.constant 0.000000e+00 : f32
    %31 = vector.shape_cast %25 : vector<1x256xi1> to vector<1x256xi1>
    %32 = vector.broadcast %31 : vector<1x256xi1> to vector<8x256xi1>
    %33 = vector.broadcast %cst_18 : f32 to vector<8x256xf32>
    %34 = arith.select %32, %33, %30 : vector<8x256xi1>, vector<8x256xf32>
    %c0_19 = arith.constant 0 : index
    %c0_20 = arith.constant 0 : index
    %35 = vector.load %arg8[%c0_19, %c0_20] : memref<216x256xf32, #tpu.memory_space<vmem>>, vector<8x256xf32>
    tpu.vector_store %arg8[%c0_19, %c0_20], %34 {strides = array<i32>} : memref<216x256xf32, #tpu.memory_space<vmem>>, vector<8x256xf32>,
    %c0_21 = arith.constant 0 : index
    %c1 = arith.constant 1 : index
    %36 = vector.load %arg9[%c0_21, %c1] : memref<8x290xf32, #tpu.memory_space<vmem>>, vector<8x256xf32>
    %c24 = arith.constant 24 : index
    %c0_22 = arith.constant 0 : index
    %37 = vector.load %arg8[%c24, %c0_22] : memref<216x256xf32, #tpu.memory_space<vmem>>, vector<8x256xf32>
    tpu.vector_store %arg8[%c24, %c0_22], %36 {strides = array<i32>} : memref<216x256xf32, #tpu.memory_space<vmem>>, vector<8x256xf32>,
    %c0_23 = arith.constant 0 : index
    %c2 = arith.constant 2 : index
    %38 = vector.load %arg9[%c0_23, %c2] : memref<8x290xf32, #tpu.memory_space<vmem>>, vector<8x256xf32>
    %cst_24 = arith.constant 0.000000e+00 : f32
    %39 = vector.shape_cast %27 : vector<1x256xi1> to vector<1x256xi1>
    %40 = vector.broadcast %39 : vector<1x256xi1> to vector<8x256xi1>
    %41 = vector.broadcast %cst_24 : f32 to vector<8x256xf32>
    %42 = arith.select %40, %41, %38 : vector<8x256xi1>, vector<8x256xf32>
    %c48 = arith.constant 48 : index
    %c0_25 = arith.constant 0 : index
    %43 = vector.load %arg8[%c48, %c0_25] : memref<216x256xf32, #tpu.memory_space<vmem>>, vector<8x256xf32>
    tpu.vector_store %arg8[%c48, %c0_25], %42 {strides = array<i32>} : memref<216x256xf32, #tpu.memory_space<vmem>>, vector<8x256xf32>,
    %c0_26 = arith.constant 0 : index
    %c16 = arith.constant 16 : index
    %44 = vector.load %arg9[%c0_26, %c16] : memref<8x290xf32, #tpu.memory_space<vmem>>, vector<8x256xf32>
    %cst_27 = arith.constant 0.000000e+00 : f32
    %45 = vector.shape_cast %25 : vector<1x256xi1> to vector<1x256xi1>
    %46 = vector.broadcast %45 : vector<1x256xi1> to vector<8x256xi1>
    %47 = vector.broadcast %cst_27 : f32 to vector<8x256xf32>
    %48 = arith.select %46, %47, %44 : vector<8x256xi1>, vector<8x256xf32>
    %c72 = arith.constant 72 : index
    %c0_28 = arith.constant 0 : index
    %49 = vector.load %arg8[%c72, %c0_28] : memref<216x256xf32, #tpu.memory_space<vmem>>, vector<8x256xf32>
    tpu.vector_store %arg8[%c72, %c0_28], %48 {strides = array<i32>} : memref<216x256xf32, #tpu.memory_space<vmem>>, vector<8x256xf32>,
    %c0_29 = arith.constant 0 : index
    %c17_30 = arith.constant 17 : index
    %50 = vector.load %arg9[%c0_29, %c17_30] : memref<8x290xf32, #tpu.memory_space<vmem>>, vector<8x256xf32>
    %c96 = arith.constant 96 : index
    %c0_31 = arith.constant 0 : index
    %51 = vector.load %arg8[%c96, %c0_31] : memref<216x256xf32, #tpu.memory_space<vmem>>, vector<8x256xf32>
    tpu.vector_store %arg8[%c96, %c0_31], %50 {strides = array<i32>} : memref<216x256xf32, #tpu.memory_space<vmem>>, vector<8x256xf32>,
    %c0_32 = arith.constant 0 : index
    %c18 = arith.constant 18 : index
    %52 = vector.load %arg9[%c0_32, %c18] : memref<8x290xf32, #tpu.memory_space<vmem>>, vector<8x256xf32>
    %cst_33 = arith.constant 0.000000e+00 : f32
    %53 = vector.shape_cast %27 : vector<1x256xi1> to vector<1x256xi1>
    %54 = vector.broadcast %53 : vector<1x256xi1> to vector<8x256xi1>
    %55 = vector.broadcast %cst_33 : f32 to vector<8x256xf32>
    %56 = arith.select %54, %55, %52 : vector<8x256xi1>, vector<8x256xf32>
    %c120 = arith.constant 120 : index
    %c0_34 = arith.constant 0 : index
    %57 = vector.load %arg8[%c120, %c0_34] : memref<216x256xf32, #tpu.memory_space<vmem>>, vector<8x256xf32>
    tpu.vector_store %arg8[%c120, %c0_34], %56 {strides = array<i32>} : memref<216x256xf32, #tpu.memory_space<vmem>>, vector<8x256xf32>,
    %c0_35 = arith.constant 0 : index
    %c32 = arith.constant 32 : index
    %58 = vector.load %arg9[%c0_35, %c32] : memref<8x290xf32, #tpu.memory_space<vmem>>, vector<8x256xf32>
    %cst_36 = arith.constant 0.000000e+00 : f32
    %59 = vector.shape_cast %25 : vector<1x256xi1> to vector<1x256xi1>
    %60 = vector.broadcast %59 : vector<1x256xi1> to vector<8x256xi1>
    %61 = vector.broadcast %cst_36 : f32 to vector<8x256xf32>
    %62 = arith.select %60, %61, %58 : vector<8x256xi1>, vector<8x256xf32>
    %c144 = arith.constant 144 : index
    %c0_37 = arith.constant 0 : index
    %63 = vector.load %arg8[%c144, %c0_37] : memref<216x256xf32, #tpu.memory_space<vmem>>, vector<8x256xf32>
    tpu.vector_store %arg8[%c144, %c0_37], %62 {strides = array<i32>} : memref<216x256xf32, #tpu.memory_space<vmem>>, vector<8x256xf32>,
    %c0_38 = arith.constant 0 : index
    %c33 = arith.constant 33 : index
    %64 = vector.load %arg9[%c0_38, %c33] : memref<8x290xf32, #tpu.memory_space<vmem>>, vector<8x256xf32>
    %c168 = arith.constant 168 : index
    %c0_39 = arith.constant 0 : index
    %65 = vector.load %arg8[%c168, %c0_39] : memref<216x256xf32, #tpu.memory_space<vmem>>, vector<8x256xf32>
    tpu.vector_store %arg8[%c168, %c0_39], %64 {strides = array<i32>} : memref<216x256xf32, #tpu.memory_space<vmem>>, vector<8x256xf32>,
    %c0_40 = arith.constant 0 : index
    %c34 = arith.constant 34 : index
    %66 = vector.load %arg9[%c0_40, %c34] : memref<8x290xf32, #tpu.memory_space<vmem>>, vector<8x256xf32>
    %cst_41 = arith.constant 0.000000e+00 : f32
    %67 = vector.shape_cast %27 : vector<1x256xi1> to vector<1x256xi1>
    %68 = vector.broadcast %67 : vector<1x256xi1> to vector<8x256xi1>
    %69 = vector.broadcast %cst_41 : f32 to vector<8x256xf32>
    %70 = arith.select %68, %69, %66 : vector<8x256xi1>, vector<8x256xf32>
    %c192 = arith.constant 192 : index
    %c0_42 = arith.constant 0 : index
    %71 = vector.load %arg8[%c192, %c0_42] : memref<216x256xf32, #tpu.memory_space<vmem>>, vector<8x256xf32>
    tpu.vector_store %arg8[%c192, %c0_42], %70 {strides = array<i32>} : memref<216x256xf32, #tpu.memory_space<vmem>>, vector<8x256xf32>,
    %c0_43 = arith.constant 0 : index
    %c0_44 = arith.constant 0 : index
    %c0_45 = arith.constant 0 : index
    %72 = vector.load %arg2[%c0_43, %c0_44, %c0_45] : memref<3x8x216xf32, #tpu.memory_space<vmem>>, vector<1x8x216xf32>
    %73 = vector.shape_cast %72 : vector<1x8x216xf32> to vector<8x216xf32>
    %c0_46 = arith.constant 0 : index
    %c0_47 = arith.constant 0 : index
    %74 = vector.load %arg8[%c0_46, %c0_47] : memref<216x256xf32, #tpu.memory_space<vmem>>, vector<216x256xf32>
    %cst_48 = arith.constant dense<0.000000e+00> : vector<8x256xf32>
    %75 = tpu.matmul %73, %74, %cst_48 {dimension_numbers = #tpu.dot_dimension_numbers<[1], [0], [0], [1], [0, 0, 1, 1], [], []>} : vector<8x216xf32>, vector<216x256xf32>, vector<8x256xf32> -> vector<8x256xf32>
    %c0_49 = arith.constant 0 : index
    %c0_50 = arith.constant 0 : index
    %c0_51 = arith.constant 0 : index
    %76 = vector.load %arg3[%c0_49, %c0_50, %c0_51] : memref<3x8x1xf32, #tpu.memory_space<vmem>>, vector<1x8x1xf32>
    %77 = vector.shape_cast %76 : vector<1x8x1xf32> to vector<8x1xf32>
    %78 = vector.broadcast %77 : vector<8x1xf32> to vector<8x256xf32>
    %79 = arith.addf %75, %78 : vector<8x256xf32>
    %cst_52 = arith.constant 0.000000e+00 : f32
    %80 = vector.broadcast %cst_52 : f32 to vector<8x256xf32>
    %81 = arith.maximumf %79, %80 : vector<8x256xf32>
    %c8 = arith.constant 8 : index
    %c0_53 = arith.constant 0 : index
    %82 = vector.load %arg7[%c8, %c0_53] : memref<32x256xf32, #tpu.memory_space<vmem>>, vector<8x256xf32>
    tpu.vector_store %arg7[%c8, %c0_53], %81 {strides = array<i32>} : memref<32x256xf32, #tpu.memory_space<vmem>>, vector<8x256xf32>,
    %c8_54 = arith.constant 8 : index
    %c0_55 = arith.constant 0 : index
    %83 = vector.load %arg7[%c8_54, %c0_55] : memref<32x256xf32, #tpu.memory_space<vmem>>, vector<8x256xf32>
    %c0_56 = arith.constant 0 : index
    %c17_57 = arith.constant 17 : index
    %84 = vector.load %arg9[%c0_56, %c17_57] : memref<8x290xf32, #tpu.memory_space<vmem>>, vector<8x256xf32>
    tpu.vector_store %arg9[%c0_56, %c17_57], %83 {strides = array<i32>} : memref<8x290xf32, #tpu.memory_space<vmem>>, vector<8x256xf32>,
    %c0_58 = arith.constant 0 : index
    %c0_59 = arith.constant 0 : index
    %85 = vector.load %arg9[%c0_58, %c0_59] : memref<8x290xf32, #tpu.memory_space<vmem>>, vector<8x256xf32>
    %cst_60 = arith.constant 0.000000e+00 : f32
    %86 = vector.shape_cast %25 : vector<1x256xi1> to vector<1x256xi1>
    %87 = vector.broadcast %86 : vector<1x256xi1> to vector<8x256xi1>
    %88 = vector.broadcast %cst_60 : f32 to vector<8x256xf32>
    %89 = arith.select %87, %88, %85 : vector<8x256xi1>, vector<8x256xf32>
    %c8_61 = arith.constant 8 : index
    %c0_62 = arith.constant 0 : index
    %90 = vector.load %arg8[%c8_61, %c0_62] : memref<216x256xf32, #tpu.memory_space<vmem>>, vector<8x256xf32>
    tpu.vector_store %arg8[%c8_61, %c0_62], %89 {strides = array<i32>} : memref<216x256xf32, #tpu.memory_space<vmem>>, vector<8x256xf32>,
    %c0_63 = arith.constant 0 : index
    %c1_64 = arith.constant 1 : index
    %91 = vector.load %arg9[%c0_63, %c1_64] : memref<8x290xf32, #tpu.memory_space<vmem>>, vector<8x256xf32>
    %c32_65 = arith.constant 32 : index
    %c0_66 = arith.constant 0 : index
    %92 = vector.load %arg8[%c32_65, %c0_66] : memref<216x256xf32, #tpu.memory_space<vmem>>, vector<8x256xf32>
    tpu.vector_store %arg8[%c32_65, %c0_66], %91 {strides = array<i32>} : memref<216x256xf32, #tpu.memory_space<vmem>>, vector<8x256xf32>,
    %c0_67 = arith.constant 0 : index
    %c2_68 = arith.constant 2 : index
    %93 = vector.load %arg9[%c0_67, %c2_68] : memref<8x290xf32, #tpu.memory_space<vmem>>, vector<8x256xf32>
    %cst_69 = arith.constant 0.000000e+00 : f32
    %94 = vector.shape_cast %27 : vector<1x256xi1> to vector<1x256xi1>
    %95 = vector.broadcast %94 : vector<1x256xi1> to vector<8x256xi1>
    %96 = vector.broadcast %cst_69 : f32 to vector<8x256xf32>
    %97 = arith.select %95, %96, %93 : vector<8x256xi1>, vector<8x256xf32>
    %c56 = arith.constant 56 : index
    %c0_70 = arith.constant 0 : index
    %98 = vector.load %arg8[%c56, %c0_70] : memref<216x256xf32, #tpu.memory_space<vmem>>, vector<8x256xf32>
    tpu.vector_store %arg8[%c56, %c0_70], %97 {strides = array<i32>} : memref<216x256xf32, #tpu.memory_space<vmem>>, vector<8x256xf32>,
    %c0_71 = arith.constant 0 : index
    %c16_72 = arith.constant 16 : index
    %99 = vector.load %arg9[%c0_71, %c16_72] : memref<8x290xf32, #tpu.memory_space<vmem>>, vector<8x256xf32>
    %cst_73 = arith.constant 0.000000e+00 : f32
    %100 = vector.shape_cast %25 : vector<1x256xi1> to vector<1x256xi1>
    %101 = vector.broadcast %100 : vector<1x256xi1> to vector<8x256xi1>
    %102 = vector.broadcast %cst_73 : f32 to vector<8x256xf32>
    %103 = arith.select %101, %102, %99 : vector<8x256xi1>, vector<8x256xf32>
    %c80 = arith.constant 80 : index
    %c0_74 = arith.constant 0 : index
    %104 = vector.load %arg8[%c80, %c0_74] : memref<216x256xf32, #tpu.memory_space<vmem>>, vector<8x256xf32>
    tpu.vector_store %arg8[%c80, %c0_74], %103 {strides = array<i32>} : memref<216x256xf32, #tpu.memory_space<vmem>>, vector<8x256xf32>,
    %c0_75 = arith.constant 0 : index
    %c17_76 = arith.constant 17 : index
    %105 = vector.load %arg9[%c0_75, %c17_76] : memref<8x290xf32, #tpu.memory_space<vmem>>, vector<8x256xf32>
    %c104 = arith.constant 104 : index
    %c0_77 = arith.constant 0 : index
    %106 = vector.load %arg8[%c104, %c0_77] : memref<216x256xf32, #tpu.memory_space<vmem>>, vector<8x256xf32>
    tpu.vector_store %arg8[%c104, %c0_77], %105 {strides = array<i32>} : memref<216x256xf32, #tpu.memory_space<vmem>>, vector<8x256xf32>,
    %c0_78 = arith.constant 0 : index
    %c18_79 = arith.constant 18 : index
    %107 = vector.load %arg9[%c0_78, %c18_79] : memref<8x290xf32, #tpu.memory_space<vmem>>, vector<8x256xf32>
    %cst_80 = arith.constant 0.000000e+00 : f32
    %108 = vector.shape_cast %27 : vector<1x256xi1> to vector<1x256xi1>
    %109 = vector.broadcast %108 : vector<1x256xi1> to vector<8x256xi1>
    %110 = vector.broadcast %cst_80 : f32 to vector<8x256xf32>
    %111 = arith.select %109, %110, %107 : vector<8x256xi1>, vector<8x256xf32>
    %c128 = arith.constant 128 : index
    %c0_81 = arith.constant 0 : index
    %112 = vector.load %arg8[%c128, %c0_81] : memref<216x256xf32, #tpu.memory_space<vmem>>, vector<8x256xf32>
    tpu.vector_store %arg8[%c128, %c0_81], %111 {strides = array<i32>} : memref<216x256xf32, #tpu.memory_space<vmem>>, vector<8x256xf32>,
    %c0_82 = arith.constant 0 : index
    %c32_83 = arith.constant 32 : index
    %113 = vector.load %arg9[%c0_82, %c32_83] : memref<8x290xf32, #tpu.memory_space<vmem>>, vector<8x256xf32>
    %cst_84 = arith.constant 0.000000e+00 : f32
    %114 = vector.shape_cast %25 : vector<1x256xi1> to vector<1x256xi1>
    %115 = vector.broadcast %114 : vector<1x256xi1> to vector<8x256xi1>
    %116 = vector.broadcast %cst_84 : f32 to vector<8x256xf32>
    %117 = arith.select %115, %116, %113 : vector<8x256xi1>, vector<8x256xf32>
    %c152 = arith.constant 152 : index
    %c0_85 = arith.constant 0 : index
    %118 = vector.load %arg8[%c152, %c0_85] : memref<216x256xf32, #tpu.memory_space<vmem>>, vector<8x256xf32>
    tpu.vector_store %arg8[%c152, %c0_85], %117 {strides = array<i32>} : memref<216x256xf32, #tpu.memory_space<vmem>>, vector<8x256xf32>,
    %c0_86 = arith.constant 0 : index
    %c33_87 = arith.constant 33 : index
    %119 = vector.load %arg9[%c0_86, %c33_87] : memref<8x290xf32, #tpu.memory_space<vmem>>, vector<8x256xf32>
    %c176 = arith.constant 176 : index
    %c0_88 = arith.constant 0 : index
    %120 = vector.load %arg8[%c176, %c0_88] : memref<216x256xf32, #tpu.memory_space<vmem>>, vector<8x256xf32>
    tpu.vector_store %arg8[%c176, %c0_88], %119 {strides = array<i32>} : memref<216x256xf32, #tpu.memory_space<vmem>>, vector<8x256xf32>,
    %c0_89 = arith.constant 0 : index
    %c34_90 = arith.constant 34 : index
    %121 = vector.load %arg9[%c0_89, %c34_90] : memref<8x290xf32, #tpu.memory_space<vmem>>, vector<8x256xf32>
    %cst_91 = arith.constant 0.000000e+00 : f32
    %122 = vector.shape_cast %27 : vector<1x256xi1> to vector<1x256xi1>
    %123 = vector.broadcast %122 : vector<1x256xi1> to vector<8x256xi1>
    %124 = vector.broadcast %cst_91 : f32 to vector<8x256xf32>
    %125 = arith.select %123, %124, %121 : vector<8x256xi1>, vector<8x256xf32>
    %c200 = arith.constant 200 : index
    %c0_92 = arith.constant 0 : index
    %126 = vector.load %arg8[%c200, %c0_92] : memref<216x256xf32, #tpu.memory_space<vmem>>, vector<8x256xf32>
    tpu.vector_store %arg8[%c200, %c0_92], %125 {strides = array<i32>} : memref<216x256xf32, #tpu.memory_space<vmem>>, vector<8x256xf32>,
    %c1_93 = arith.constant 1 : index
    %c0_94 = arith.constant 0 : index
    %c0_95 = arith.constant 0 : index
    %127 = vector.load %arg2[%c1_93, %c0_94, %c0_95] : memref<3x8x216xf32, #tpu.memory_space<vmem>>, vector<1x8x216xf32>
    %128 = vector.shape_cast %127 : vector<1x8x216xf32> to vector<8x216xf32>
    %c0_96 = arith.constant 0 : index
    %c0_97 = arith.constant 0 : index
    %129 = vector.load %arg8[%c0_96, %c0_97] : memref<216x256xf32, #tpu.memory_space<vmem>>, vector<216x256xf32>
    %cst_98 = arith.constant dense<0.000000e+00> : vector<8x256xf32>
    %130 = tpu.matmul %128, %129, %cst_98 {dimension_numbers = #tpu.dot_dimension_numbers<[1], [0], [0], [1], [0, 0, 1, 1], [], []>} : vector<8x216xf32>, vector<216x256xf32>, vector<8x256xf32> -> vector<8x256xf32>
    %c1_99 = arith.constant 1 : index
    %c0_100 = arith.constant 0 : index
    %c0_101 = arith.constant 0 : index
    %131 = vector.load %arg3[%c1_99, %c0_100, %c0_101] : memref<3x8x1xf32, #tpu.memory_space<vmem>>, vector<1x8x1xf32>
    %132 = vector.shape_cast %131 : vector<1x8x1xf32> to vector<8x1xf32>
    %133 = vector.broadcast %132 : vector<8x1xf32> to vector<8x256xf32>
    %134 = arith.addf %130, %133 : vector<8x256xf32>
    %cst_102 = arith.constant 0.000000e+00 : f32
    %135 = vector.broadcast %cst_102 : f32 to vector<8x256xf32>
    %136 = arith.maximumf %134, %135 : vector<8x256xf32>
    %c16_103 = arith.constant 16 : index
    %c0_104 = arith.constant 0 : index
    %137 = vector.load %arg7[%c16_103, %c0_104] : memref<32x256xf32, #tpu.memory_space<vmem>>, vector<8x256xf32>
    tpu.vector_store %arg7[%c16_103, %c0_104], %136 {strides = array<i32>} : memref<32x256xf32, #tpu.memory_space<vmem>>, vector<8x256xf32>,
    %c16_105 = arith.constant 16 : index
    %c0_106 = arith.constant 0 : index
    %138 = vector.load %arg7[%c16_105, %c0_106] : memref<32x256xf32, #tpu.memory_space<vmem>>, vector<8x256xf32>
    %c0_107 = arith.constant 0 : index
    %c17_108 = arith.constant 17 : index
    %139 = vector.load %arg9[%c0_107, %c17_108] : memref<8x290xf32, #tpu.memory_space<vmem>>, vector<8x256xf32>
    tpu.vector_store %arg9[%c0_107, %c17_108], %138 {strides = array<i32>} : memref<8x290xf32, #tpu.memory_space<vmem>>, vector<8x256xf32>,
    %c0_109 = arith.constant 0 : index
    %c0_110 = arith.constant 0 : index
    %140 = vector.load %arg9[%c0_109, %c0_110] : memref<8x290xf32, #tpu.memory_space<vmem>>, vector<8x256xf32>
    %cst_111 = arith.constant 0.000000e+00 : f32
    %141 = vector.shape_cast %25 : vector<1x256xi1> to vector<1x256xi1>
    %142 = vector.broadcast %141 : vector<1x256xi1> to vector<8x256xi1>
    %143 = vector.broadcast %cst_111 : f32 to vector<8x256xf32>
    %144 = arith.select %142, %143, %140 : vector<8x256xi1>, vector<8x256xf32>
    %c16_112 = arith.constant 16 : index
    %c0_113 = arith.constant 0 : index
    %145 = vector.load %arg8[%c16_112, %c0_113] : memref<216x256xf32, #tpu.memory_space<vmem>>, vector<8x256xf32>
    tpu.vector_store %arg8[%c16_112, %c0_113], %144 {strides = array<i32>} : memref<216x256xf32, #tpu.memory_space<vmem>>, vector<8x256xf32>,
    %c0_114 = arith.constant 0 : index
    %c1_115 = arith.constant 1 : index
    %146 = vector.load %arg9[%c0_114, %c1_115] : memref<8x290xf32, #tpu.memory_space<vmem>>, vector<8x256xf32>
    %c40 = arith.constant 40 : index
    %c0_116 = arith.constant 0 : index
    %147 = vector.load %arg8[%c40, %c0_116] : memref<216x256xf32, #tpu.memory_space<vmem>>, vector<8x256xf32>
    tpu.vector_store %arg8[%c40, %c0_116], %146 {strides = array<i32>} : memref<216x256xf32, #tpu.memory_space<vmem>>, vector<8x256xf32>,
    %c0_117 = arith.constant 0 : index
    %c2_118 = arith.constant 2 : index
    %148 = vector.load %arg9[%c0_117, %c2_118] : memref<8x290xf32, #tpu.memory_space<vmem>>, vector<8x256xf32>
    %cst_119 = arith.constant 0.000000e+00 : f32
    %149 = vector.shape_cast %27 : vector<1x256xi1> to vector<1x256xi1>
    %150 = vector.broadcast %149 : vector<1x256xi1> to vector<8x256xi1>
    %151 = vector.broadcast %cst_119 : f32 to vector<8x256xf32>
    %152 = arith.select %150, %151, %148 : vector<8x256xi1>, vector<8x256xf32>
    %c64 = arith.constant 64 : index
    %c0_120 = arith.constant 0 : index
    %153 = vector.load %arg8[%c64, %c0_120] : memref<216x256xf32, #tpu.memory_space<vmem>>, vector<8x256xf32>
    tpu.vector_store %arg8[%c64, %c0_120], %152 {strides = array<i32>} : memref<216x256xf32, #tpu.memory_space<vmem>>, vector<8x256xf32>,
    %c0_121 = arith.constant 0 : index
    %c16_122 = arith.constant 16 : index
    %154 = vector.load %arg9[%c0_121, %c16_122] : memref<8x290xf32, #tpu.memory_space<vmem>>, vector<8x256xf32>
    %cst_123 = arith.constant 0.000000e+00 : f32
    %155 = vector.shape_cast %25 : vector<1x256xi1> to vector<1x256xi1>
    %156 = vector.broadcast %155 : vector<1x256xi1> to vector<8x256xi1>
    %157 = vector.broadcast %cst_123 : f32 to vector<8x256xf32>
    %158 = arith.select %156, %157, %154 : vector<8x256xi1>, vector<8x256xf32>
    %c88 = arith.constant 88 : index
    %c0_124 = arith.constant 0 : index
    %159 = vector.load %arg8[%c88, %c0_124] : memref<216x256xf32, #tpu.memory_space<vmem>>, vector<8x256xf32>
    tpu.vector_store %arg8[%c88, %c0_124], %158 {strides = array<i32>} : memref<216x256xf32, #tpu.memory_space<vmem>>, vector<8x256xf32>,
    %c0_125 = arith.constant 0 : index
    %c17_126 = arith.constant 17 : index
    %160 = vector.load %arg9[%c0_125, %c17_126] : memref<8x290xf32, #tpu.memory_space<vmem>>, vector<8x256xf32>
    %c112 = arith.constant 112 : index
    %c0_127 = arith.constant 0 : index
    %161 = vector.load %arg8[%c112, %c0_127] : memref<216x256xf32, #tpu.memory_space<vmem>>, vector<8x256xf32>
    tpu.vector_store %arg8[%c112, %c0_127], %160 {strides = array<i32>} : memref<216x256xf32, #tpu.memory_space<vmem>>, vector<8x256xf32>,
    %c0_128 = arith.constant 0 : index
    %c18_129 = arith.constant 18 : index
    %162 = vector.load %arg9[%c0_128, %c18_129] : memref<8x290xf32, #tpu.memory_space<vmem>>, vector<8x256xf32>
    %cst_130 = arith.constant 0.000000e+00 : f32
    %163 = vector.shape_cast %27 : vector<1x256xi1> to vector<1x256xi1>
    %164 = vector.broadcast %163 : vector<1x256xi1> to vector<8x256xi1>
    %165 = vector.broadcast %cst_130 : f32 to vector<8x256xf32>
    %166 = arith.select %164, %165, %162 : vector<8x256xi1>, vector<8x256xf32>
    %c136 = arith.constant 136 : index
    %c0_131 = arith.constant 0 : index
    %167 = vector.load %arg8[%c136, %c0_131] : memref<216x256xf32, #tpu.memory_space<vmem>>, vector<8x256xf32>
    tpu.vector_store %arg8[%c136, %c0_131], %166 {strides = array<i32>} : memref<216x256xf32, #tpu.memory_space<vmem>>, vector<8x256xf32>,
    %c0_132 = arith.constant 0 : index
    %c32_133 = arith.constant 32 : index
    %168 = vector.load %arg9[%c0_132, %c32_133] : memref<8x290xf32, #tpu.memory_space<vmem>>, vector<8x256xf32>
    %cst_134 = arith.constant 0.000000e+00 : f32
    %169 = vector.shape_cast %25 : vector<1x256xi1> to vector<1x256xi1>
    %170 = vector.broadcast %169 : vector<1x256xi1> to vector<8x256xi1>
    %171 = vector.broadcast %cst_134 : f32 to vector<8x256xf32>
    %172 = arith.select %170, %171, %168 : vector<8x256xi1>, vector<8x256xf32>
    %c160 = arith.constant 160 : index
    %c0_135 = arith.constant 0 : index
    %173 = vector.load %arg8[%c160, %c0_135] : memref<216x256xf32, #tpu.memory_space<vmem>>, vector<8x256xf32>
    tpu.vector_store %arg8[%c160, %c0_135], %172 {strides = array<i32>} : memref<216x256xf32, #tpu.memory_space<vmem>>, vector<8x256xf32>,
    %c0_136 = arith.constant 0 : index
    %c33_137 = arith.constant 33 : index
    %174 = vector.load %arg9[%c0_136, %c33_137] : memref<8x290xf32, #tpu.memory_space<vmem>>, vector<8x256xf32>
    %c184 = arith.constant 184 : index
    %c0_138 = arith.constant 0 : index
    %175 = vector.load %arg8[%c184, %c0_138] : memref<216x256xf32, #tpu.memory_space<vmem>>, vector<8x256xf32>
    tpu.vector_store %arg8[%c184, %c0_138], %174 {strides = array<i32>} : memref<216x256xf32, #tpu.memory_space<vmem>>, vector<8x256xf32>,
    %c0_139 = arith.constant 0 : index
    %c34_140 = arith.constant 34 : index
    %176 = vector.load %arg9[%c0_139, %c34_140] : memref<8x290xf32, #tpu.memory_space<vmem>>, vector<8x256xf32>
    %cst_141 = arith.constant 0.000000e+00 : f32
    %177 = vector.shape_cast %27 : vector<1x256xi1> to vector<1x256xi1>
    %178 = vector.broadcast %177 : vector<1x256xi1> to vector<8x256xi1>
    %179 = vector.broadcast %cst_141 : f32 to vector<8x256xf32>
    %180 = arith.select %178, %179, %176 : vector<8x256xi1>, vector<8x256xf32>
    %c208 = arith.constant 208 : index
    %c0_142 = arith.constant 0 : index
    %181 = vector.load %arg8[%c208, %c0_142] : memref<216x256xf32, #tpu.memory_space<vmem>>, vector<8x256xf32>
    tpu.vector_store %arg8[%c208, %c0_142], %180 {strides = array<i32>} : memref<216x256xf32, #tpu.memory_space<vmem>>, vector<8x256xf32>,
    %c2_143 = arith.constant 2 : index
    %c0_144 = arith.constant 0 : index
    %c0_145 = arith.constant 0 : index
    %182 = vector.load %arg2[%c2_143, %c0_144, %c0_145] : memref<3x8x216xf32, #tpu.memory_space<vmem>>, vector<1x8x216xf32>
    %183 = vector.shape_cast %182 : vector<1x8x216xf32> to vector<8x216xf32>
    %c0_146 = arith.constant 0 : index
    %c0_147 = arith.constant 0 : index
    %184 = vector.load %arg8[%c0_146, %c0_147] : memref<216x256xf32, #tpu.memory_space<vmem>>, vector<216x256xf32>
    %cst_148 = arith.constant dense<0.000000e+00> : vector<8x256xf32>
    %185 = tpu.matmul %183, %184, %cst_148 {dimension_numbers = #tpu.dot_dimension_numbers<[1], [0], [0], [1], [0, 0, 1, 1], [], []>} : vector<8x216xf32>, vector<216x256xf32>, vector<8x256xf32> -> vector<8x256xf32>
    %c2_149 = arith.constant 2 : index
    %c0_150 = arith.constant 0 : index
    %c0_151 = arith.constant 0 : index
    %186 = vector.load %arg3[%c2_149, %c0_150, %c0_151] : memref<3x8x1xf32, #tpu.memory_space<vmem>>, vector<1x8x1xf32>
    %187 = vector.shape_cast %186 : vector<1x8x1xf32> to vector<8x1xf32>
    %188 = vector.broadcast %187 : vector<8x1xf32> to vector<8x256xf32>
    %189 = arith.addf %185, %188 : vector<8x256xf32>
    %cst_152 = arith.constant 0.000000e+00 : f32
    %190 = vector.broadcast %cst_152 : f32 to vector<8x256xf32>
    %191 = arith.maximumf %189, %190 : vector<8x256xf32>
    %c24_153 = arith.constant 24 : index
    %c0_154 = arith.constant 0 : index
    %192 = vector.load %arg7[%c24_153, %c0_154] : memref<32x256xf32, #tpu.memory_space<vmem>>, vector<8x256xf32>
    tpu.vector_store %arg7[%c24_153, %c0_154], %191 {strides = array<i32>} : memref<32x256xf32, #tpu.memory_space<vmem>>, vector<8x256xf32>,
    %c0_155 = arith.constant 0 : index
    %c0_156 = arith.constant 0 : index
    %193 = vector.load %arg4[%c0_155, %c0_156] : memref<8x32xf32, #tpu.memory_space<vmem>>, vector<8x32xf32>
    %c0_157 = arith.constant 0 : index
    %c0_158 = arith.constant 0 : index
    %194 = vector.load %arg7[%c0_157, %c0_158] : memref<32x256xf32, #tpu.memory_space<vmem>>, vector<32x256xf32>
    %cst_159 = arith.constant dense<0.000000e+00> : vector<8x256xf32>
    %195 = tpu.matmul %193, %194, %cst_159 {dimension_numbers = #tpu.dot_dimension_numbers<[1], [0], [0], [1], [0, 0, 1, 1], [], []>} : vector<8x32xf32>, vector<32x256xf32>, vector<8x256xf32> -> vector<8x256xf32>
    %c0_160 = arith.constant 0 : index
    %c0_161 = arith.constant 0 : index
    %196 = vector.load %arg5[%c0_160, %c0_161] : memref<8x1xf32, #tpu.memory_space<vmem>>, vector<8x1xf32>
    %197 = vector.broadcast %196 : vector<8x1xf32> to vector<8x256xf32>
    %198 = arith.addf %195, %197 : vector<8x256xf32>
    %c0_162 = arith.constant 0 : index
    %c0_163 = arith.constant 0 : index
    %c0_164 = arith.constant 0 : index
    %199 = vector.load %arg1[%c0_162, %c0_163, %c0_164] : memref<1x8x256xf32, #tpu.memory_space<vmem>>, vector<1x8x256xf32>
    %200 = vector.shape_cast %199 : vector<1x8x256xf32> to vector<8x256xf32>
    %201 = arith.addf %198, %200 : vector<8x256xf32>
    %c0_165 = arith.constant 0 : index
    %c0_166 = arith.constant 0 : index
    %c0_167 = arith.constant 0 : index
    %202 = vector.load %arg6[%c0_165, %c0_166, %c0_167] : memref<1x8x256xf32, #tpu.memory_space<vmem>>, vector<1x8x256xf32>
    %203 = vector.shape_cast %202 : vector<1x8x256xf32> to vector<8x256xf32>
    %204 = vector.shape_cast %201 : vector<8x256xf32> to vector<1x8x256xf32>
    tpu.vector_store %arg6[%c0_165, %c0_166, %c0_167], %204 {strides = array<i32>} : memref<1x8x256xf32, #tpu.memory_space<vmem>>, vector<1x8x256xf32>,
    return
  }
  func.func @transform_0(%arg0: i32) -> (i32, i32, i32) {
    %c0_i32 = arith.constant 0 : i32
    %c0_i32_0 = arith.constant 0 : i32
    %c0_i32_1 = arith.constant 0 : i32
    return %arg0, %c0_i32, %c0_i32_0 : i32, i32, i32
  }
  func.func @transform_1(%arg0: i32) -> (i32, i32, i32) {
    %c0_i32 = arith.constant 0 : i32
    %c0_i32_0 = arith.constant 0 : i32
    %c0_i32_1 = arith.constant 0 : i32
    %c0_i32_2 = arith.constant 0 : i32
    return %c0_i32, %c0_i32_0, %c0_i32_1 : i32, i32, i32
  }
  func.func @transform_2(%arg0: i32) -> (i32, i32, i32) {
    %c0_i32 = arith.constant 0 : i32
    %c0_i32_0 = arith.constant 0 : i32
    %c0_i32_1 = arith.constant 0 : i32
    %c0_i32_2 = arith.constant 0 : i32
    return %c0_i32, %c0_i32_0, %c0_i32_1 : i32, i32, i32
  }
  func.func @transform_3(%arg0: i32) -> (i32, i32) {
    %c0_i32 = arith.constant 0 : i32
    %c0_i32_0 = arith.constant 0 : i32
    %c0_i32_1 = arith.constant 0 : i32
    return %c0_i32, %c0_i32_0 : i32, i32
  }
  func.func @transform_4(%arg0: i32) -> (i32, i32) {
    %c0_i32 = arith.constant 0 : i32
    %c0_i32_0 = arith.constant 0 : i32
    %c0_i32_1 = arith.constant 0 : i32
    return %c0_i32, %c0_i32_0 : i32, i32
  }
  func.func @transform_5(%arg0: i32) -> (i32, i32, i32) {
    %c0_i32 = arith.constant 0 : i32
    %c0_i32_0 = arith.constant 0 : i32
    %c0_i32_1 = arith.constant 0 : i32
    return %arg0, %c0_i32, %c0_i32_0 : i32, i32, i32
  }
}

</mosaic_0001>

<bundles_post_ra>
// kernel: rdb_forward.1
= control target key start
LH: loop header
LB: loop body
LE: loop exit
PB: predicated region body
PF: predicated region fallthrough
CT: control target
= control target key end

     0   :  { %s1990_s18 = smov 0   ;;  %s2637_s0 = inlined_call_operand.vmem [shape: f32[2,8,256], index: 0, kind: input, shape index: {}]   ;;  %s2638_s1 = inlined_call_operand.vmem [shape: f32[3,8,216], index: 1, kind: input, shape index: {}]   ;;  %s2639_s2 = inlined_call_operand.vmem [shape: f32[3,8,1], index: 2, kind: input, shape index: {}]   ;;  %s2640_s3 = inlined_call_operand.vmem [shape: f32[8,32], index: 3, kind: input, shape index: {}]   ;;  %s2641_s4 = inlined_call_operand.vmem [shape: f32[8,1], index: 4, kind: input, shape index: {}]   ;;  %s2642_s5 = inlined_call_operand.vmem [shape: f32[2,8,256], index: 5, kind: output, shape index: {}]  }
   0x1 LB: > { %s1437_s19 = sadd.s32 4294967295, %s1945_s18   ;;  %p1441_p0 = scmp.ge.s32.totalorder %s1945_s18, 1  ;;  %s1945_s18 = sphi %s1990_s18, %s15_s18  }
   0x2   : > { %p187_p1 = scmp.lt.s32.totalorder %s1945_s18, 3 }
   0x4   : > { %p188_p2 = pnand %p1441_p0, %p187_p1 }
   0x5   : > { %p215_p3 = scmp.lt.s32.totalorder (!%p188_p2), %s1437_s19, 1  ;;  %vm281_vm0 = vcmask (!%p188_p2), 277504   ;;  %v1947_v0 = vmov (!%p188_p2), 0.0   ;;  %v287_v1 = vlaneseq (!%p188_p2)  ;;  %s1948_s24 = smov (!%p188_p2), 17   ;;  %vm2653_vm1 = vcmask (!%p188_p2), 1047688   ;;  %v512_v20 = vld [vmem:[%s2638_s1 + $0x8] sm:$0xff] (!%p188_p2) }
   0x6   : > { %191 = sbr.rel (%p188_p2) target bundleno = 1771 (0x6eb), region = 40  ;;  %279 = vst [vmem:[#allocation4] sm:$0xff] (!%p188_p2), %v1947_v0  ;;  %282 = vst.msk [vmem:[#allocation4 + $0x10] sm:$0xff] (!%p188_p2), %vm281_vm0, %v1947_v0  ;;  %vm2648_vm2 = vcmask (!%p188_p2), 138240   ;;  %v2656_v9 = vmov (!%p188_p2), 0  ;;  %vm1949_vm4 = vmmov (!%p188_p2), 1  }
   0x7   : > { %v2002_v2 = vand.u32 (!%p188_p2), 127, %v287_v1  ;;  %v2660_v13 = vmov (!%p188_p2), 0  ;;  %s1950_s25 = smov (!%p188_p2), 126   ;;  %s1951_s26 = smov (!%p188_p2), 127   ;;  %vm2646_vm8 = vcmask (!%p188_p2), 719872   ;;  %v567_v21 = vld [vmem:[%s2639_s2] sm:$0xff] (!%p188_p2) }
   0x8   : > { %s1952_s27 = smov (!%p188_p2), 112   ;;  %s1953_s28 = smov (!%p188_p2), 111   ;;  %1446 = vmatprep.mubr.msk.f32.mxu0 (!%p188_p2), %vm2646_vm8, %v512_v20  ;;  %v1958_v22 = vmov (!%p188_p2), 0   ;;  %vm2644_vm9 = vcmask (!%p188_p2), 1039360   ;;  %vm2643_vm10 = vcmask (!%p188_p2), 1031168   ;;  %vm2645_vm12 = vcmask (!%p188_p2), 916480  }
   0x9   : > { %v2013_v3 = vadd.s32 (!%p188_p2), 128, %v2002_v2  ;;  %v294_v4 = vand.u32 (!%p188_p2), 15, %v2002_v2  ;;  %s1954_s29 = smov (!%p188_p2), 110   ;;  %s1955_s30 = smov (!%p188_p2), 96   ;;  %1862 = vset.pattern.permute.xlu1 (!%p188_p2), %v1958_v22  ;;  %1903 = vset.pattern.permute.xlu0 (!%p188_p2), %v1958_v22  ;;  %v1959_v40 = vmov (!%p188_p2), 0.0|0.0   ;;  %v1451_v16 = vld [vmem:[%s2638_s1 + $0x20] sm:$0xff] (!%p188_p2) }
   0xa   : > { %s1956_s6 = smov (!%p188_p2), 95   ;;  %s1957_s7 = smov (!%p188_p2), 94   ;;  %v1286_v42 = vld [vmem:[%s2640_s3] sm:$0xff] (!%p188_p2) }
   0xb   : > { %v301_v6 = vand.u32 (!%p188_p2), 15, %v2013_v3  ;;  %vm2047_vm6 = vcmp.ne.s32.totalorder (!%p188_p2), %v294_v4, 0  ;;  %vm2137_vm14 = vcmp.ne.s32.totalorder (!%p188_p2), %v294_v4, 15 }
   0xc   : > { %v2661_v13 = vsel (!%p188_p2), %vm2047_vm6, 4294967295, %v2660_v13  ;;  %vm2060_vm7 = vmpackc.low (!%p188_p2), %vm1949_vm4, %vm2047_vm6 }
   0xd   : > { %s2730_s19 = smov (!%p215_p3, %s1437_s19), 1  ;;  %vm2030_vm3 = vcmp.ne.s32.totalorder %v301_v6, 0  ;;  %vm2119_vm11 = vcmp.ne.s32.totalorder %v301_v6, 15  ;;  %vm2155_vm15 = vmpackc.low %vm1949_vm4, %vm2137_vm14 }
   0xe   : > { %s1458_s20 = sshll.u32 %s2730_s19, 4  ;;  %v2657_v9 = vsel %vm2030_vm3, 4294967295, %v2656_v9  ;;  %vm2041_vm5 = vmpackc.low %vm1949_vm4, %vm2030_vm3 }
   0xf   : > { %s2010_s23 = scalar_lea.vmem %s2637_s0, %s1458_s20  ;;  %vm2131_vm13 = vmpackc.low %vm1949_vm4, %vm2119_vm11  ;;  %s224_s11 = scalar_lea.vmem %s2642_s5, %s1458_s20 }
  0x10   : > { %v2017_v5 = vld [vmem:[%s2010_s23] sm:$0xff]  ;;  %v2023_v7 = vld [vmem:[%s2010_s23 + $0x8] sm:$0xff]  ;;  %vm2164_vm0 = vmpackc.low %vm2030_vm3, %vm1949_vm4 }
  0x11   : > { %322 = vrot.lane.b32.xlu0 %v2017_v5, %s1948_s24  ;;  %vm2212_vm8 = vmpackc.low %vm2119_vm11, %vm1949_vm4 }
  0x15   : > { %324 = vrot.lane.b32.xlu0 %v2023_v7, %s1948_s24 }
  0x83   : > { %v323_v8 = vpop.permute.xlu0 %322 }
  0x84   : > { %332 = vst.msk [vmem:[#allocation4] sm:$0xff] %vm2653_vm1, %v323_v8 }
  0x87   : > { %v325_v10 = vpop.permute.xlu0 %324 }
  0x88   : > { %v2035_v11 = vsel %vm2648_vm2, %v323_v8, %v325_v10  ;;  %334 = vst.msk [vmem:[#allocation4 + $0x10] sm:$0xff] %vm2648_vm2, %v325_v10  ;;  %vm2229_vm2 = vmpackc.low %vm2137_vm14, %vm1949_vm4 }
  0x89   : > { %v1604_v14 = vpack.c.bf16 %v1947_v0, %v2035_v11 }
  0x8b   : > { %1606 = vmatprep.subr.msk.bf16.mxu0 %vm2041_vm5, %v1604_v14  ;;  %v2055_v15 = vld [vmem:[#allocation4] sm:$0xff] }
  0x8c   : > { %v1607_v17 = vpack.c.bf16 %v1947_v0, %v2055_v15 }
  0x8e   : > { %1609 = vmatpush1.bf16.msk.msra.mxu0 %vm2060_vm7, %v1607_v17 }
  0x8f   : > { %v366_v18 = vld [vmem:[#allocation4 + $0x10] sm:$0xff] }
  0x90   : > { %v1832_v19 = vpack.i.bf16 %v366_v18, %v2035_v11 }
  0x92   : > { %1833 = vrot.lane.b32.xlu0 %v1832_v19, %s1950_s25  ;;  %1828 = vrot.lane.b32.xlu1 %v1832_v19, %s1951_s26 }
  0x96   : > { %1838 = vrot.lane.b32.xlu0 %v1832_v19, %s1952_s27  ;;  %351 = vrot.lane.b32.xlu1 %v2055_v15, %s1951_s26 }
  0x9a   : > { %1843 = vrot.lane.b32.xlu0 %v1832_v19, %s1953_s28  ;;  %374 = vrot.lane.b32.xlu1 %v2055_v15, %s1950_s25 }
  0x9e   : > { %1848 = vrot.lane.b32.xlu0 %v1832_v19, %s1954_s29  ;;  %395 = vrot.lane.b32.xlu1 %v2055_v15, %s1952_s27 }
  0xa2   : > { %1853 = vrot.lane.b32.xlu0 %v1832_v19, %s1955_s30  ;;  %416 = vrot.lane.b32.xlu1 %v2055_v15, %s1953_s28 }
  0xa6   : > { %1858 = vrot.lane.b32.xlu0 %v1832_v19, %s1956_s6  ;;  %435 = vrot.lane.b32.xlu1 %v2055_v15, %s1954_s29 }
  0xaa   : > { %498 = vrot.lane.b32.xlu0 %v2035_v11, %s1957_s7  ;;  %456 = vrot.lane.b32.xlu1 %v2055_v15, %s1955_s30 }
  0xae   : > { %496 = vrot.lane.b32.xlu0 %v2055_v15, %s1957_s7  ;;  %477 = vrot.lane.b32.xlu1 %v2055_v15, %s1956_s6 }
  0xb2   : > { %500 = vrot.lane.b32.xlu1 %v366_v18, %s1957_s7 }
  0xb6   : > { %570 = vperm.xlu1 %1862, %v567_v21  }
 0x104   : > { %v1834_v23 = vpop.permute.xlu0 %1833  ;;  %v1829_v24 = vpop.permute.xlu1 %1828 }
 0x105   : > { %v1831_v25 = vunpack.i.h.bf16 %v1829_v24  ;;  %v1830_v26 = vunpack.i.l.bf16 %v1829_v24  ;;  %v1836_v28 = vunpack.i.h.bf16 %v1834_v23  ;;  %v1835_v29 = vunpack.i.l.bf16 %v1834_v23 }
 0x107   : > { %v2103_v27 = vsel %vm2644_vm9, %v1830_v26, %v1831_v25  ;;  %v2124_v36 = vsel %vm2643_vm10, %v1835_v29, %v1836_v28 }
 0x108   : > { %v352_v30 = vpop.permute.xlu1 %351  ;;  %v2107_v31 = vpack.c.bf16 %v2103_v27, %v1947_v0  ;;  %v1839_v32 = vpop.permute.xlu0 %1838  ;;  %v1616_v43 = vpack.c.bf16 %v1947_v0, %v2124_v36 }
 0x109   : > { %v2110_v33 = vsel %vm2644_vm9, %v352_v30, %v1830_v26  ;;  %v1841_v37 = vunpack.i.h.bf16 %v1839_v32  ;;  %v1840_v38 = vunpack.i.l.bf16 %v1839_v32  ;;  %vm2183_vm9 = vmpackc.low %vm2047_vm6, %vm1949_vm4  ;;  %vm2650_vm4 = vcmask 769024  }
 0x10a   : > { %v2114_v34 = vpack.c.bf16 %v2110_v33, %v1947_v0  ;;  %1611 = vmatprep.subr.bf16.mxu0 %v2107_v31 }
 0x10b   : > { %v2147_v46 = vsel %vm2645_vm12, %v1840_v38, %v1841_v37 }
 0x10c   : > { %v375_v39 = vpop.permute.xlu1 %374  ;;  %1613 = vmatpush1.bf16.msra.mxu0 %v2114_v34  ;;  %v1844_v44 = vpop.permute.xlu0 %1843  ;;  %v2170_v51 = vpack.c.bf16 %v2147_v46, %v1947_v0 }
 0x10d   : > { %1614 = vmatprep.subr.bf16.mxu0 %v1959_v40  ;;  %v2144_v45 = vsel %vm2643_vm10, %v375_v39, %v1835_v29  ;;  %v1846_v53 = vunpack.i.h.bf16 %v1844_v44  ;;  %v1845_v54 = vunpack.i.l.bf16 %v1844_v44  ;;  %vm2647_vm10 = vcmask 908288  }
 0x10e   : > { %v1619_v49 = vpack.c.bf16 %v1947_v0, %v2144_v45 }
 0x10f   : > { %v2195_v61 = vsel %vm2647_vm10, %v1845_v54, %v1846_v53 }
 0x110   : > { %v396_v47 = vpop.permute.xlu1 %395  ;;  %1615 = vmatpush1.bf16.msra.mxu0 %v1959_v40  ;;  %v1849_v55 = vpop.permute.xlu0 %1848  ;;  %v1630_v1 = vpack.c.bf16 %v1947_v0, %v2195_v61 }
 0x111   : > { %1618 = vmatprep.subr.msk.bf16.mxu0 %vm2131_vm13, %v1616_v43  ;;  %v2173_v52 = vsel %vm2645_vm12, %v396_v47, %v1840_v38  ;;  %v1851_v59 = vunpack.i.h.bf16 %v1849_v55  ;;  %v1850_v60 = vunpack.i.l.bf16 %v1849_v55  ;;  %vm2649_vm12 = vcmask 900096  }
 0x112   : > { %v2189_v57 = vpack.c.bf16 %v2173_v52, %v1947_v0 }
 0x113   : > { %v2204_v2 = vsel %vm2649_vm12, %v1850_v60, %v1851_v59 }
 0x114   : > { %1621 = vmatpush1.bf16.msk.msra.mxu0 %vm2155_vm15, %v1619_v49  ;;  %v417_v58 = vpop.permute.xlu1 %416  ;;  %v1854_v62 = vpop.permute.xlu0 %1853  ;;  %v2218_v8 = vpack.c.bf16 %v2204_v2, %v1947_v0  ;;  %v511_v49 = vld [vmem:[%s2638_s1] sm:$0xff] }
 0x115   : > { %1624 = vmatprep.subr.msk.bf16.mxu0 %vm2164_vm0, %v2170_v51  ;;  %v2199_v63 = vsel %vm2647_vm10, %v417_v58, %v1845_v54  ;;  %v1856_v14 = vunpack.i.h.bf16 %v1854_v62  ;;  %v1855_v17 = vunpack.i.l.bf16 %v1854_v62  ;;  %vm2652_vm10 = vcmask 785408  }
 0x116   : > { %v1632_v4 = vpack.c.bf16 %v1947_v0, %v2199_v63 }
 0x117   : > { %v2238_v22 = vsel %vm2652_vm10, %v1855_v17, %v1856_v14 }
 0x118   : > { %1627 = vmatpush1.bf16.msk.msra.mxu0 %vm2183_vm9, %v2189_v57  ;;  %v436_v3 = vpop.permute.xlu1 %435  ;;  %v1859_v18 = vpop.permute.xlu0 %1858  ;;  %v1642_v25 = vpack.c.bf16 %v1947_v0, %v2238_v22 }
 0x119   : > { %1628 = vmatprep.subr.bf16.mxu0 %v1959_v40  ;;  %v2221_v10 = vsel %vm2649_vm12, %v436_v3, %v1850_v60  ;;  %v1861_v23 = vunpack.i.h.bf16 %v1859_v18  ;;  %v1860_v24 = vunpack.i.l.bf16 %v1859_v18  ;;  %vm2651_vm12 = vcmask 777216  }
 0x11a   : > { %v2235_v20 = vpack.c.bf16 %v2221_v10, %v1947_v0 }
 0x11b   : > { %v2251_v29 = vsel %vm2651_vm12, %v1860_v24, %v1861_v23 }
 0x11c   : > { %1629 = vmatpush1.bf16.msra.mxu0 %v1959_v40  ;;  %v457_v21 = vpop.permute.xlu1 %456  ;;  %v2262_v37 = vpack.c.bf16 %v2251_v29, %v1947_v0  ;;  %v499_v38 = vpop.permute.xlu0 %498 }
 0x11d   : > { %1631 = vmatprep.subr.bf16.mxu0 %v1630_v1  ;;  %v2247_v26 = vsel %vm2652_vm10, %v457_v21, %v1855_v17  ;;  %vm2307_vm10 = vmpackc.low %vm2030_vm3, %vm2030_vm3 }
 0x11e   : > { %v1645_v30 = vpack.c.bf16 %v1947_v0, %v2247_v26 }
 0x120   : > { %1633 = vmatpush1.bf16.msra.mxu0 %v1632_v4  ;;  %v478_v28 = vpop.permute.xlu1 %477  ;;  %v497_v44 = vpop.permute.xlu0 %496 }
 0x121   : > { %1636 = vmatprep.subr.msk.bf16.mxu0 %vm2212_vm8, %v2218_v8  ;;  %v2258_v32 = vsel %vm2651_vm12, %v478_v28, %v1860_v24  ;;  %v2284_v53 = vsel %vm2650_vm4, %v497_v44, %v499_v38 }
 0x122   : > { %v2269_v39 = vpack.c.bf16 %v2258_v32, %v1947_v0 }
 0x124   : > { %1639 = vmatpush1.bf16.msk.msra.mxu0 %vm2229_vm2, %v2235_v20  ;;  %v501_v43 = vpop.permute.xlu1 %500 }
 0x125   : > { %1640 = vmatprep.subr.bf16.mxu0 %v1959_v40  ;;  %v2274_v47 = vsel %vm2650_vm4, %v499_v38, %v501_v43  ;;  %vm2680_vm4 = vcmask 138240  }
 0x126   : > { %vm2681_vm12 = vmmov %vm2680_vm4 }
 0x128   : > { %1641 = vmatpush1.bf16.msra.mxu0 %v1959_v40 }
 0x129   : > { %1644 = vmatprep.subr.msk.bf16.mxu0 %vm2041_vm5, %v1642_v25 }
 0x12c   : > { %1647 = vmatpush1.bf16.msk.msra.mxu0 %vm2060_vm7, %v1645_v30 }
 0x12d   : > { %1649 = vmatprep.subr.bf16.mxu0 %v2262_v37 }
 0x130   : > { %1651 = vmatpush1.bf16.msra.mxu0 %v2269_v39 }
 0x131   : > { %1652 = vmatprep.subr.bf16.mxu0 %v1959_v40 }
 0x134   : > { %1653 = vmatpush1.bf16.msra.mxu0 %v1959_v40 }
 0x135   : > { %1481 = vmatprep.subr.msk.mxu0 %vm2119_vm11, %v2274_v47  ;;  %v571_v54 = vpop.permute.xlu1 %570 }
 0x138   : > { %1483 = vmatpush1.msk.msra.mxu0 %vm2137_vm14, %v2284_v53 }
 0x139   : > { %642 = vmatmul.mubr.f32.vlgmr.msra.gmra.mrb[0].mxu0 %v511_v49 }
 0x20c   : > { %v643_v55 = vpop.f32.mrb[0].mxu0 }
 0x20d   : > { %v2289_v58 = vadd.f32 %v643_v55, %v571_v54  ;;  %v645_v40 = vpop.f32.mrb[1].mxu0 }
 0x20e   : > { %v2291_v59 = vadd.f32 %v645_v40, %v571_v54 }
 0x20f   : > { %v648_v60 = vmax.f32 %v2289_v58, 0.0 }
 0x210   : > { %v649_v62 = vmax.f32 %v2291_v59, 0.0 }
 0x211   : > { %656 = vrot.lane.b32.xlu0 %v648_v60, %s1948_s24 }
 0x212   : > { %658 = vrot.lane.b32.xlu1 %v649_v62, %s1948_s24 }
 0x283   : > { %v657_v1 = vpop.permute.xlu0 %656 }
 0x284   : > { %664 = vst.msk [vmem:[#allocation4] sm:$0xff] %vm2653_vm1, %v657_v1  ;;  %v659_v3 = vpop.permute.xlu1 %658  ;;  %vm2687_vm1 = vcmask 1039360  }
 0x285   : > { %v660_v4 = vsel %vm2680_vm4, %v657_v1, %v659_v3  ;;  %666 = vst.msk [vmem:[#allocation4 + $0x10] sm:$0xff] %vm2681_vm12, %v659_v3  ;;  %vm2319_vm12 = vmpackc.low %vm2047_vm6, %vm2047_vm6  ;;  %vm2686_vm4 = vcmask 719872  }
 0x286   : > { %v1654_v17 = vpack.c.bf16 %v660_v4, %v2035_v11  ;;  %vm2688_vm6 = vmmov %vm2687_vm1 }
 0x288   : > { %1656 = vmatprep.subr.msk.bf16.mxu1 %vm2307_vm10, %v1654_v17  ;;  %1724 = vmatprep.subr.msk.bf16.mxu0 %vm2307_vm10, %v1654_v17 }
 0x28b   : > { %v673_v18 = vld [vmem:[#allocation4] sm:$0xff] }
 0x28c   : > { %679 = vrot.lane.b32.xlu1 %v673_v18, %s1951_s26  ;;  %v675_v23 = vld [vmem:[#allocation4 + $0x10] sm:$0xff]  ;;  %v1657_v24 = vpack.c.bf16 %v673_v18, %v2055_v15  ;;  %v1448_v15 = vld [vmem:[%s2638_s1 + $0x18] sm:$0xff] }
 0x28d   : > { %v1863_v11 = vpack.i.bf16 %v675_v23, %v660_v4  ;;  %1450 = vmatprep.mubr.msk.f32.mxu1 %vm2686_vm4, %v1448_v15  ;;  %vm2689_vm4 = vcmask 1031168  }
 0x28e   : > { %1659 = vmatpush1.bf16.msk.msra.mxu1 %vm2319_vm12, %v1657_v24  ;;  %1727 = vmatpush1.bf16.msk.msra.mxu0 %vm2319_vm12, %v1657_v24  ;;  %vm2690_vm3 = vmmov %vm2689_vm4 }
 0x28f   : > { %1864 = vrot.lane.b32.xlu0 %v1863_v11, %s1951_s26  ;;  %1661 = vmatprep.subr.bf16.mxu1 %v2107_v31  ;;  %v1449_v31 = vld [vmem:[%s2639_s2 + $0x8] sm:$0xff] }
 0x290   : > { %697 = vrot.lane.b32.xlu1 %v673_v18, %s1950_s25 }
 0x292   : > { %1663 = vmatpush1.bf16.msra.mxu1 %v2114_v34 }
 0x293   : > { %1869 = vrot.lane.b32.xlu0 %v1863_v11, %s1950_s25 }
 0x294   : > { %717 = vrot.lane.b32.xlu1 %v673_v18, %s1952_s27 }
 0x297   : > { %1874 = vrot.lane.b32.xlu0 %v1863_v11, %s1952_s27 }
 0x298   : > { %737 = vrot.lane.b32.xlu1 %v673_v18, %s1953_s28 }
 0x29b   : > { %1879 = vrot.lane.b32.xlu0 %v1863_v11, %s1953_s28 }
 0x29c   : > { %755 = vrot.lane.b32.xlu1 %v673_v18, %s1954_s29 }
 0x29f   : > { %1884 = vrot.lane.b32.xlu0 %v1863_v11, %s1954_s29 }
 0x2a0   : > { %775 = vrot.lane.b32.xlu1 %v673_v18, %s1955_s30 }
 0x2a3   : > { %1889 = vrot.lane.b32.xlu0 %v1863_v11, %s1955_s30 }
 0x2a4   : > { %795 = vrot.lane.b32.xlu1 %v673_v18, %s1956_s6 }
 0x2a7   : > { %1894 = vrot.lane.b32.xlu0 %v1863_v11, %s1956_s6 }
 0x2a8   : > { %813 = vrot.lane.b32.xlu1 %v673_v18, %s1957_s7 }
 0x2ab   : > { %1899 = vrot.lane.b32.xlu0 %v1863_v11, %s1957_s7 }
 0x2af   : > { %888 = vperm.xlu0 %1903, %v1449_v31  }
 0x2fe   : > { %v680_v34 = vpop.permute.xlu1 %679 }
 0x301   : > { %v1865_v25 = vpop.permute.xlu0 %1864 }
 0x302   : > { %v1867_v28 = vunpack.i.h.bf16 %v1865_v25  ;;  %v1866_v30 = vunpack.i.l.bf16 %v1865_v25  ;;  %v698_v55 = vpop.permute.xlu1 %697 }
 0x304   : > { %v2354_v38 = vsel %vm2687_vm1, %v1866_v30, %v1867_v28  ;;  %v2357_v43 = vsel %vm2688_vm6, %v680_v34, %v1866_v30  ;;  %vm2368_vm1 = vmpackc.low %vm2119_vm11, %vm2119_vm11 }
 0x305   : > { %v1870_v44 = vpop.permute.xlu0 %1869  ;;  %v1664_v49 = vpack.c.bf16 %v1947_v0, %v2354_v38  ;;  %v1666_v54 = vpack.c.bf16 %v1947_v0, %v2357_v43  ;;  %vm2381_vm6 = vmpackc.low %vm2137_vm14, %vm2137_vm14 }
 0x306   : > { %v1872_v40 = vunpack.i.h.bf16 %v1870_v44  ;;  %v1871_v1 = vunpack.i.l.bf16 %v1870_v44  ;;  %v718_v34 = vpop.permute.xlu1 %717 }
 0x307   : > { %1665 = vmatprep.subr.bf16.mxu1 %v1664_v49 }
 0x308   : > { %v703_v3 = vsel %vm2689_vm4, %v698_v55, %v1871_v1  ;;  %v704_v4 = vsel %vm2690_vm3, %v1871_v1, %v1872_v40  ;;  %1667 = vmatpush1.bf16.msra.mxu1 %v1666_v54  ;;  %vm2695_vm3 = vcmask 916480  }
 0x309   : > { %v2373_v18 = vpack.c.bf16 %v704_v4, %v2124_v36  ;;  %v2376_v23 = vpack.c.bf16 %v703_v3, %v2144_v45  ;;  %v1875_v24 = vpop.permute.xlu0 %1874  ;;  %vm2696_vm4 = vmmov %vm2695_vm3 }
 0x30a   : > { %v1877_v15 = vunpack.i.h.bf16 %v1875_v24  ;;  %v1876_v31 = vunpack.i.l.bf16 %v1875_v24  ;;  %v738_v50 = vpop.permute.xlu1 %737 }
 0x30b   : > { %1670 = vmatprep.subr.msk.bf16.mxu1 %vm2368_vm1, %v2373_v18 }
 0x30c   : > { %v2389_v36 = vsel %vm2695_vm3, %v1876_v31, %v1877_v15  ;;  %1673 = vmatpush1.bf16.msk.msra.mxu1 %vm2381_vm6, %v2376_v23  ;;  %v2398_v30 = vsel %vm2696_vm4, %v718_v34, %v1876_v31  ;;  %vm2697_vm3 = vcmask 908288  }
 0x30d   : > { %v1880_v45 = vpop.permute.xlu0 %1879  ;;  %1676 = vmatprep.subr.msk.bf16.mxu1 %vm2164_vm0, %v2170_v51  ;;  %v1680_v44 = vpack.c.bf16 %v1947_v0, %v2389_v36  ;;  %v1683_v51 = vpack.c.bf16 %v1947_v0, %v2398_v30  ;;  %vm2698_vm0 = vmmov %vm2697_vm3 }
 0x30e   : > { %v1882_v25 = vunpack.i.h.bf16 %v1880_v45  ;;  %v1881_v28 = vunpack.i.l.bf16 %v1880_v45  ;;  %v756_v4 = vpop.permute.xlu1 %755 }
 0x310   : > { %1679 = vmatpush1.bf16.msk.msra.mxu1 %vm2183_vm9, %v2189_v57  ;;  %v744_v49 = vsel %vm2697_vm3, %v1881_v28, %v1882_v25  ;;  %v743_v40 = vsel %vm2698_vm0, %v738_v50, %v1881_v28  ;;  %vm2699_vm9 = vcmask 900096   ;;  %vm2701_vm3 = vcmask 785408  }
 0x311   : > { %v1885_v54 = vpop.permute.xlu0 %1884  ;;  %1682 = vmatprep.subr.msk.bf16.mxu1 %vm2041_vm5, %v1680_v44  ;;  %v2411_v55 = vpack.c.bf16 %v744_v49, %v2195_v61  ;;  %v2418_v57 = vpack.c.bf16 %v743_v40, %v2199_v63  ;;  %vm2700_vm4 = vmmov %vm2699_vm9 }
 0x312   : > { %v1887_v1 = vunpack.i.h.bf16 %v1885_v54  ;;  %v1886_v3 = vunpack.i.l.bf16 %v1885_v54  ;;  %v776_v25 = vpop.permute.xlu1 %775  ;;  %vm2702_vm0 = vmmov %vm2701_vm3 }
 0x314   : > { %1685 = vmatpush1.bf16.msk.msra.mxu1 %vm2060_vm7, %v1683_v51  ;;  %v2421_v24 = vsel %vm2699_vm9, %v1886_v3, %v1887_v1  ;;  %v2428_v31 = vsel %vm2700_vm4, %v756_v4, %v1886_v3  ;;  %vm2705_vm9 = vcmask 769024  }
 0x315   : > { %v1890_v56 = vpop.permute.xlu0 %1889  ;;  %1687 = vmatprep.subr.bf16.mxu1 %v2411_v55  ;;  %v1696_v34 = vpack.c.bf16 %v1947_v0, %v2421_v24  ;;  %vm2706_vm4 = vmmov %vm2705_vm9 }
 0x316   : > { %v1892_v15 = vunpack.i.h.bf16 %v1890_v56  ;;  %v1891_v61 = vunpack.i.l.bf16 %v1890_v56 }
 0x318   : > { %1689 = vmatpush1.bf16.msra.mxu1 %v2418_v57  ;;  %v782_v45 = vsel %vm2701_vm3, %v1891_v61, %v1892_v15  ;;  %v781_v28 = vsel %vm2702_vm0, %v776_v25, %v1891_v61  ;;  %v1796_v61 = vpack.c.bf16 %v648_v60, %v2017_v5  ;;  %vm2707_vm3 = vcmask 1047688  }
 0x319   : > { %1692 = vmatprep.subr.msk.bf16.mxu1 %vm2212_vm8, %v2218_v8  ;;  %v1895_v63 = vpop.permute.xlu0 %1894  ;;  %v1699_v8 = vpack.c.bf16 %v1947_v0, %v2428_v31  ;;  %v2442_v44 = vpack.c.bf16 %v782_v45, %v2238_v22  ;;  %v2450_v41 = vpack.c.bf16 %v781_v28, %v2247_v26  ;;  %vm2708_vm0 = vcmask 138240  }
 0x31a   : > { %v1897_v49 = vunpack.i.h.bf16 %v1895_v63  ;;  %v1896_v54 = vunpack.i.l.bf16 %v1895_v63 }
 0x31c   : > { %1695 = vmatpush1.bf16.msk.msra.mxu1 %vm2229_vm2, %v2235_v20  ;;  %v796_v20 = vpop.permute.xlu1 %795 }
 0x31d   : > { %1698 = vmatprep.subr.msk.bf16.mxu1 %vm2131_vm13, %v1696_v34  ;;  %v1900_v50 = vpop.permute.xlu0 %1899  ;;  %vm2703_vm13 = vcmask 777216  }
 0x31e   : > { %v1902_v51 = vunpack.i.h.bf16 %v1900_v50  ;;  %v1901_v40 = vunpack.i.l.bf16 %v1900_v50  ;;  %v2456_v22 = vsel %vm2703_vm13, %v1896_v54, %v1897_v49 }
 0x31f   : > { %v1712_v48 = vpack.c.bf16 %v1947_v0, %v2456_v22 }
 0x320   : > { %1701 = vmatpush1.bf16.msk.msra.mxu1 %vm2155_vm15, %v1699_v8  ;;  %vm2704_vm15 = vmmov %vm2703_vm13  ;;  %v820_v26 = vsel %vm2705_vm9, %v1901_v40, %v1902_v51  ;;  %v814_v3 = vpop.permute.xlu1 %813  ;;  %vm2711_vm9 = vcmask 1039360  }
 0x321   : > { %1704 = vmatprep.subr.msk.bf16.mxu1 %vm2307_vm10, %v2442_v44  ;;  %v2462_v1 = vsel %vm2704_vm15, %v796_v20, %v1896_v54  ;;  %v819_v4 = vsel %vm2706_vm4, %v814_v3, %v1901_v40  ;;  %v2470_v15 = vpack.c.bf16 %v820_v26, %v2274_v47  ;;  %v1447_v47 = vld [vmem:[%s2638_s1 + $0x10] sm:$0xff]  ;;  %vm2709_vm13 = vmmov %vm2708_vm0  ;;  %v1452_v54 = vld [vmem:[%s2638_s1 + $0x28] sm:$0xff]  ;;  %vm2710_vm15 = vcmask 719872  }
 0x322   : > { %v1714_v56 = vpack.c.bf16 %v1947_v0, %v2462_v1  ;;  %1454 = vmatprep.mubr.msk.f32.mxu0 %vm2710_vm15, %v1452_v54  ;;  %vm2712_vm4 = vmmov %vm2711_vm9 }
 0x324   : > { %1707 = vmatpush1.bf16.msk.msra.mxu1 %vm2319_vm12, %v2450_v41 }
 0x325   : > { %1709 = vmatprep.subr.bf16.mxu1 %v2262_v37  ;;  %v2476_v37 = vpack.c.bf16 %v819_v4, %v2284_v53 }
 0x328   : > { %1711 = vmatpush1.bf16.msra.mxu1 %v2269_v39  ;;  %v1794_v39 = vpack.c.bf16 %v649_v62, %v2023_v7 }
 0x329   : > { %1713 = vmatprep.subr.bf16.mxu1 %v1712_v48 }
 0x32c   : > { %1715 = vmatpush1.bf16.msra.mxu1 %v1714_v56 }
 0x32d   : > { %1718 = vmatprep.subr.msk.bf16.mxu1 %vm2368_vm1, %v2470_v15 }
 0x32e   : > { %v889_v53 = vpop.permute.xlu0 %888 }
 0x330   : > { %1721 = vmatpush1.bf16.msk.msra.mxu1 %vm2381_vm6, %v2476_v37 }
 0x331   : > { %1795 = vmatprep.subr.bf16.mxu1 %v1794_v39 }
 0x333   : > { %959 = vmatmul.mubr.f32.vlgmr.msra.gmra.mrb[0].mxu1 %v1447_v47 }
 0x334   : > { %1797 = vmatpush1.bf16.msra.mxu1 %v1796_v61  ;;  %1369 = vmatprep.mubr.f32.mxu1 %v1947_v0 }
 0x406   : > { %v960_v59 = vpop.f32.mrb[0].mxu1 }
 0x407   : > { %v2491_v7 = vadd.f32 %v960_v59, %v889_v53  ;;  %v962_v62 = vpop.f32.mrb[1].mxu1 }
 0x408   : > { %v2494_v63 = vadd.f32 %v962_v62, %v889_v53 }
 0x409   : > { %v965_v34 = vmax.f32 %v2491_v7, 0.0 }
 0x40a   : > { %v966_v58 = vmax.f32 %v2494_v63, 0.0 }
 0x40b   : > { %973 = vrot.lane.b32.xlu1 %v965_v34, %s1948_s24 }
 0x40f   : > { %975 = vrot.lane.b32.xlu1 %v966_v58, %s1948_s24 }
 0x47d   : > { %v974_v0 = vpop.permute.xlu1 %973 }
 0x47e   : > { %981 = vst.msk [vmem:[#allocation4] sm:$0xff] %vm2707_vm3, %v974_v0  ;;  %vm2713_vm3 = vcmask 1031168  }
 0x47f   : > { %vm2715_vm15 = vmmov %vm2713_vm3 }
 0x481   : > { %v976_v5 = vpop.permute.xlu1 %975 }
 0x482   : > { %v977_v60 = vsel %vm2708_vm0, %v974_v0, %v976_v5  ;;  %983 = vst.msk [vmem:[#allocation4 + $0x10] sm:$0xff] %vm2709_vm13, %v976_v5  ;;  %vm2714_vm0 = vnez %v2657_v9 }
 0x483   : > { %v1728_v45 = vpack.c.bf16 %v2103_v27, %v977_v60  ;;  %v1453_v27 = vld [vmem:[%s2639_s2 + $0x10] sm:$0xff]  ;;  %vm1745_vm13 = vmpackc.low %vm2714_vm0, %vm2119_vm11 }
 0x485   : > { %v990_v25 = vld [vmem:[#allocation4] sm:$0xff]  ;;  %1730 = vmatprep.subr.msk.bf16.mxu0 %vm2041_vm5, %v1728_v45 }
 0x486   : > { %996 = vrot.lane.b32.xlu1 %v990_v25, %s1951_s26  ;;  %v1731_v8 = vpack.c.bf16 %v2110_v33, %v990_v25  ;;  %v1295_v33 = vld [vmem:[%s2641_s4] sm:$0xff] }
 0x488   : > { %1733 = vmatpush1.bf16.msk.msra.mxu0 %vm2060_vm7, %v1731_v8 }
 0x489   : > { %v992_v28 = vld [vmem:[#allocation4 + $0x10] sm:$0xff] }
 0x48a   : > { %1014 = vrot.lane.b32.xlu1 %v990_v25, %s1950_s25  ;;  %v1904_v49 = vpack.i.bf16 %v992_v28, %v977_v60 }
 0x48c   : > { %1905 = vrot.lane.b32.xlu0 %v1904_v49, %s1951_s26 }
 0x48e   : > { %1034 = vrot.lane.b32.xlu1 %v990_v25, %s1952_s27 }
 0x490   : > { %1910 = vrot.lane.b32.xlu0 %v1904_v49, %s1950_s25 }
 0x492   : > { %1054 = vrot.lane.b32.xlu1 %v990_v25, %s1953_s28 }
 0x494   : > { %1915 = vrot.lane.b32.xlu0 %v1904_v49, %s1952_s27 }
 0x496   : > { %1072 = vrot.lane.b32.xlu1 %v990_v25, %s1954_s29 }
 0x498   : > { %1920 = vrot.lane.b32.xlu0 %v1904_v49, %s1953_s28 }
 0x49a   : > { %1092 = vrot.lane.b32.xlu1 %v990_v25, %s1955_s30 }
 0x49c   : > { %1925 = vrot.lane.b32.xlu0 %v1904_v49, %s1954_s29 }
 0x49e   : > { %1112 = vrot.lane.b32.xlu1 %v990_v25, %s1956_s6 }
 0x4a0   : > { %1930 = vrot.lane.b32.xlu0 %v1904_v49, %s1955_s30 }
 0x4a2   : > { %1134 = vrot.lane.b32.xlu1 %v992_v28, %s1957_s7 }
 0x4a4   : > { %1935 = vrot.lane.b32.xlu0 %v1904_v49, %s1956_s6 }
 0x4a6   : > { %1205 = vperm.xlu1 %1862, %v1453_v27  }
 0x4a8   : > { %1132 = vrot.lane.b32.xlu0 %v977_v60, %s1957_s7 }
 0x4ac   : > { %1130 = vrot.lane.b32.xlu0 %v990_v25, %s1957_s7 }
 0x4b0   : > { %1298 = vperm.xlu0 %1903, %v1295_v33  }
 0x4f8   : > { %v997_v20 = vpop.permute.xlu1 %996 }
 0x4fc   : > { %v1015_v61 = vpop.permute.xlu1 %1014 }
 0x4fe   : > { %v1906_v50 = vpop.permute.xlu0 %1905 }
 0x4ff   : > { %v1908_v51 = vunpack.i.h.bf16 %v1906_v50  ;;  %v1907_v40 = vunpack.i.l.bf16 %v1906_v50 }
 0x501   : > { %v1002_v48 = vsel %vm2711_vm9, %v997_v20, %v1907_v40  ;;  %v1003_v26 = vsel %vm2712_vm4, %v1907_v40, %v1908_v51  ;;  %vm2716_vm9 = vcmask 916480   ;;  %vm2717_vm4 = vnez %v2661_v13 }
 0x502   : > { %v1736_v3 = vpack.c.bf16 %v1002_v48, %v2357_v43  ;;  %v1911_v56 = vpop.permute.xlu0 %1910  ;;  %v1734_v4 = vpack.c.bf16 %v1003_v26, %v2354_v38  ;;  %vm2718_vm0 = vmmov %vm2716_vm9 }
 0x503   : > { %v1913_v39 = vunpack.i.h.bf16 %v1911_v56  ;;  %v1912_v47 = vunpack.i.l.bf16 %v1911_v56 }
 0x504   : > { %1735 = vmatprep.subr.bf16.mxu0 %v1734_v4 }
 0x505   : > { %v1021_v53 = vsel %vm2713_vm3, %v1912_v47, %v1913_v39  ;;  %1737 = vmatpush1.bf16.msra.mxu0 %v1736_v3  ;;  %v1020_v38 = vsel %vm2715_vm15, %v1015_v61, %v1912_v47  ;;  %vm1748_vm3 = vmpackc.low %vm2717_vm4, %vm2137_vm14 }
 0x506   : > { %v1916_v59 = vpop.permute.xlu0 %1915  ;;  %1740 = vmatprep.subr.msk.bf16.mxu0 %vm2368_vm1, %v2373_v18  ;;  %v1744_v43 = vpack.c.bf16 %v2147_v46, %v1021_v53  ;;  %v1035_v18 = vpop.permute.xlu1 %1034  ;;  %v1747_v9 = vpack.c.bf16 %v2173_v52, %v1020_v38 }
 0x507   : > { %v1918_v62 = vunpack.i.h.bf16 %v1916_v59  ;;  %v1917_v0 = vunpack.i.l.bf16 %v1916_v59 }
 0x509   : > { %v1041_v5 = vsel %vm2716_vm9, %v1917_v0, %v1918_v62  ;;  %1743 = vmatpush1.bf16.msk.msra.mxu0 %vm2381_vm6, %v2376_v23  ;;  %v1040_v45 = vsel %vm2718_vm0, %v1035_v18, %v1917_v0  ;;  %vm2721_vm9 = vcmask 900096   ;;  %v1376_v62 = vld [vmem:[%s2010_s23] sm:$0xff] }
 0x50a   : > { %v1921_v60 = vpop.permute.xlu0 %1920  ;;  %1746 = vmatprep.subr.msk.bf16.mxu0 %vm1745_vm13, %v1744_v43  ;;  %v1750_v46 = vpack.c.bf16 %v1041_v5, %v2389_v36  ;;  %v1753_v23 = vpack.c.bf16 %v1040_v45, %v2398_v30  ;;  %v1055_v49 = vpop.permute.xlu1 %1054  ;;  %vm2719_vm13 = vcmask 908288   ;;  %vm2722_vm4 = vmmov %vm2721_vm9  ;;  %v1377_v43 = vld [vmem:[%s2010_s23 + $0x8] sm:$0xff] }
 0x50b   : > { %v1923_v25 = vunpack.i.h.bf16 %v1921_v60  ;;  %v1922_v8 = vunpack.i.l.bf16 %v1921_v60  ;;  %vm2720_vm15 = vmmov %vm2719_vm13 }
 0x50d   : > { %1749 = vmatpush1.bf16.msk.msra.mxu0 %vm1748_vm3, %v1747_v9  ;;  %v1061_v13 = vsel %vm2719_vm13, %v1922_v8, %v1923_v25  ;;  %v1060_v52 = vsel %vm2720_vm15, %v1055_v49, %v1922_v8 }
 0x50e   : > { %v1926_v28 = vpop.permute.xlu0 %1925  ;;  %1752 = vmatprep.subr.msk.bf16.mxu0 %vm2307_vm10, %v1750_v46  ;;  %v1760_v36 = vpack.c.bf16 %v2204_v2, %v1061_v13  ;;  %v1073_v30 = vpop.permute.xlu1 %1072  ;;  %v1763_v20 = vpack.c.bf16 %v2221_v10, %v1060_v52 }
 0x50f   : > { %v1928_v27 = vunpack.i.h.bf16 %v1926_v28  ;;  %v1927_v33 = vunpack.i.l.bf16 %v1926_v28 }
 0x511   : > { %1755 = vmatpush1.bf16.msk.msra.mxu0 %vm2319_vm12, %v1753_v23  ;;  %v1079_v50 = vsel %vm2721_vm9, %v1927_v33, %v1928_v27  ;;  %v1078_v51 = vsel %vm2722_vm4, %v1073_v30, %v1927_v33 }
 0x512   : > { %1757 = vmatprep.subr.bf16.mxu0 %v2411_v55  ;;  %v1931_v54 = vpop.permute.xlu0 %1930  ;;  %v1766_v40 = vpack.c.bf16 %v1079_v50, %v2421_v24  ;;  %v1093_v6 = vpop.permute.xlu1 %1092 }
 0x513   : > { %v1933_v55 = vunpack.i.h.bf16 %v1931_v54  ;;  %v1932_v48 = vunpack.i.l.bf16 %v1931_v54 }
 0x515   : > { %1759 = vmatpush1.bf16.msra.mxu0 %v2418_v57  ;;  %v1769_v57 = vpack.c.bf16 %v1078_v51, %v2428_v31 }
 0x516   : > { %1762 = vmatprep.subr.msk.bf16.mxu0 %vm2212_vm8, %v1760_v36  ;;  %v1936_v2 = vpop.permute.xlu0 %1935  ;;  %vm2723_vm8 = vcmask 785408   ;;  %v1113_v56 = vpop.permute.xlu1 %1112 }
 0x517   : > { %v1099_v26 = vsel %vm2723_vm8, %v1932_v48, %v1933_v55  ;;  %v1938_v3 = vunpack.i.h.bf16 %v1936_v2  ;;  %v1937_v10 = vunpack.i.l.bf16 %v1936_v2  ;;  %vm2724_vm3 = vmmov %vm2723_vm8 }
 0x518   : > { %v1098_v19 = vsel %vm2724_vm3, %v1093_v6, %v1932_v48  ;;  %v1778_v24 = vpack.c.bf16 %v2251_v29, %v1099_v26 }
 0x519   : > { %1765 = vmatpush1.bf16.msk.msra.mxu0 %vm2229_vm2, %v1763_v20  ;;  %vm2725_vm2 = vcmask 777216   ;;  %v1781_v4 = vpack.c.bf16 %v2258_v32, %v1098_v19 }
 0x51a   : > { %1768 = vmatprep.subr.msk.bf16.mxu0 %vm2368_vm1, %v1766_v40  ;;  %v1119_v31 = vsel %vm2725_vm2, %v1937_v10, %v1938_v3  ;;  %vm2726_vm0 = vmmov %vm2725_vm2  ;;  %v1133_v21 = vpop.permute.xlu0 %1132  ;;  %v1135_v12 = vpop.permute.xlu1 %1134 }
 0x51b   : > { %v1118_v39 = vsel %vm2726_vm0, %v1113_v56, %v1937_v10  ;;  %v1784_v14 = vpack.c.bf16 %v1119_v31, %v2456_v22 }
 0x51c   : > { %v1786_v29 = vpack.c.bf16 %v1118_v39, %v2462_v1 }
 0x51d   : > { %1771 = vmatpush1.bf16.msk.msra.mxu0 %vm2381_vm6, %v1769_v57 }
 0x51e   : > { %1774 = vmatprep.subr.msk.bf16.mxu0 %vm2307_vm10, %v2442_v44  ;;  %v1131_v32 = vpop.permute.xlu0 %1130  ;;  %vm1301_vm10 = vcmask 261120  }
 0x521   : > { %1777 = vmatpush1.bf16.msk.msra.mxu0 %vm2319_vm12, %v2450_v41 }
 0x522   : > { %1780 = vmatprep.subr.msk.bf16.mxu0 %vm2041_vm5, %v1778_v24  ;;  %vm2727_vm5 = vcmask 769024  }
 0x523   : > { %v1137_v44 = vsel %vm2727_vm5, %v1133_v21, %v1135_v12 }
 0x525   : > { %1783 = vmatpush1.bf16.msk.msra.mxu0 %vm2060_vm7, %v1781_v4  ;;  %vm2728_vm7 = vmmov %vm2727_vm5  ;;  %v1206_v17 = vpop.permute.xlu1 %1205 }
 0x526   : > { %1785 = vmatprep.subr.bf16.mxu0 %v1784_v14  ;;  %v1136_v41 = vsel %vm2728_vm7, %v1131_v32, %v1133_v21 }
 0x529   : > { %1787 = vmatpush1.bf16.msra.mxu0 %v1786_v29 }
 0x52a   : > { %1790 = vmatprep.subr.msk.bf16.mxu0 %vm2368_vm1, %v2470_v15 }
 0x52d   : > { %1793 = vmatpush1.bf16.msk.msra.mxu0 %vm2381_vm6, %v2476_v37 }
 0x52e   : > { %1601 = vmatprep.subr.msk.mxu0 %vm2119_vm11, %v1137_v44 }
 0x52f   : > { %v1299_v53 = vpop.permute.xlu0 %1298 }
 0x531   : > { %1603 = vmatpush1.msk.msra.mxu0 %vm2137_vm14, %v1136_v41 }
 0x532   : > { %1276 = vmatmul.mubr.f32.vlgmr.msra.gmra.mrb[2].mxu0 %v1451_v16 }
 0x605   : > { %v1277_v22 = vpop.f32.mrb[2].mxu0 }
 0x606   : > { %v1278_v1 = vadd.f32 %v1277_v22, %v1206_v17  ;;  %v1279_v15 = vpop.f32.mrb[3].mxu0 }
 0x607   : > { %v1280_v11 = vadd.f32 %v1279_v15, %v1206_v17 }
 0x608   : > { %v1282_v35 = vmax.f32 %v1278_v1, 0.0 }
 0x609   : > { %v1283_v37 = vmax.f32 %v1280_v11, 0.0 }
 0x60a   : > { %v1800_v61 = vpack.c.bf16 %v1282_v35, %v965_v34 }
 0x60b   : > { %v1798_v47 = vpack.c.bf16 %v1283_v37, %v966_v58 }
 0x60d   : > { %1799 = vmatprep.subr.bf16.mxu1 %v1798_v47 }
 0x60e   : > { %1801 = vmatpush1.bf16.msra.mxu1 %v1800_v61 }
 0x611   : > { %1455 = vmatmul.mubr.msk.f32.vlgmr.msra.gmra.mrb[2].mxu1 %vm1301_vm10, %v1286_v42 }
 0x6e4   : > { %v1371_v59 = vpop.f32.mrb[2].mxu1 }
 0x6e5   : > { %v1372_v0 = vadd.f32 %v1371_v59, %v1299_v53  ;;  %v1373_v38 = vpop.f32.mrb[3].mxu1 }
 0x6e6   : > { %v1374_v7 = vadd.f32 %v1373_v38, %v1299_v53 }
 0x6e7   : > { %v1378_v34 = vadd.f32 %v1376_v62, %v1372_v0 }
 0x6e8   : > { %v1379_v63 = vadd.f32 %v1377_v43, %v1374_v7 }
 0x6e9   : > { %1380 = vst [vmem:[%s224_s11] sm:$0xff] %v1378_v34 }
 0x6ea   : > { %1381 = vst [vmem:[%s224_s11 + $0x8] sm:$0xff] %v1379_v63 }
 0x6eb PF: > { %s15_s18 = sadd.s32 1, %s1945_s18  }
 0x6ec   : > { %p12_p4 = scmp.ge.s32.totalorder %s15_s18, 4  }
 0x6ee   :  { %14 = sbr.rel (!%p12_p4) target bundleno = 1 (0x1), region = 74 }

</bundles_post_ra>
